<compile_context>
chip_gen: v5e
topology: v5e:2x2
jax: 0.10.0
libtpu: 0.0.40
codegen_flags: <defaults>
</compile_context>

<pallas_src>
import functools

import jax
import jax.numpy as jnp
from jax.experimental import pallas as pl
from jax.experimental.pallas import tpu as pltpu

EPS = 1e-5
VMEM_LIMIT = 48 * 1024 * 1024   # fits v7x's 64 MiB VMEM with headroom


def _round_up(v, m):
    return (v + m - 1) // m * m


@functools.partial(jax.jit, static_argnames=("kernel_size",))
def conv_layer_forward(x, weight, bias, gamma, beta, *, kernel_size=3):
    """x: [N, Cin, H, W]; weight: [Cout, Cin, k, k]; bias/gamma/beta: [Cout].

    Returns [N, Cout, Ho, Wo] float32 (values bf16-quantized by the output
    store).  NOTE: the conv bias cancels exactly under BatchNorm
    (y + b - mean(y + b) == y - mean(y)), so the kernels never add it; keep
    that invariant if the stats pass is refactored.
    """
    n, cin, h, w = x.shape
    cout = weight.shape[0]
    k = kernel_size
    assert weight.shape == (cout, cin, k, k)
    ho, wo = h - k + 1, w - k + 1

    cin_p = _round_up(cin, 8)        # lane dim of the input slab
    cout_p = _round_up(cout, 128)    # lane-dense MXU result columns
    kk_cin = k * k * cin_p           # folded contraction depth

    # Full-width output rows: one per (output row, input column).  Columns
    # j in [wo, w) are invalid (window crosses the edge); they are masked out
    # of the stats and sliced off in the wrapper.
    m_out = ho * w
    m_img = float(ho * wo)           # valid pixels per image
    m_tot = float(n * ho * wo)
    # Slab must cover flat index (m_out - 1) + (k-1)*w + (k-1).
    hw_pad = _round_up(h * w + k - 1, 8)

    # ---- wrapper-side layout plumbing (tiny, one-time) ---------------------
    x_nhwc = jnp.transpose(x, (0, 2, 3, 1)).astype(jnp.bfloat16)
    x_nhwc = jnp.pad(x_nhwc, ((0, 0), (0, 0), (0, 0), (0, cin_p - cin)))
    x_flat = x_nhwc.reshape(n, h * w, cin_p)
    x_flat = jnp.pad(x_flat, ((0, 0), (0, hw_pad - h * w), (0, 0)))

    # weight [Cout, Cin, kh, kw] -> [(kh, kw, Cin_p) flat, Cout_p], bf16.
    w_k = jnp.transpose(weight, (2, 3, 1, 0)).astype(jnp.bfloat16)
    w_k = jnp.pad(w_k, ((0, 0), (0, 0), (0, cin_p - cin), (0, cout_p - cout)))
    w_flat = w_k.reshape(kk_cin, cout_p)

    # Valid-column mask built in the wrapper (keeps modular math off the VPU).
    mask = (jnp.arange(m_out) % w < wo).astype(jnp.float32).reshape(m_out, 1)

    # ---- shared in-kernel conv: one folded-contraction matmul per image ----
    def conv_image(x_ref, w_ref):
        # x_ref: [1, hw_pad, cin_p] bf16 ; w_ref: [kk_cin, cout_p] bf16.
        pieces = []
        for kh in range(k):
            for kw in range(k):
                off = kh * w + kw
                pieces.append(x_ref[0, off:off + m_out, :])      # [m_out, cin_p]
        lhs = jnp.concatenate(pieces, axis=-1)                   # [m_out, kk_cin]
        return jnp.dot(lhs, w_ref[...],
                       preferred_element_type=jnp.float32)       # [m_out, cout_p]

    # ---- pass 1: per-image centered stats (sum, M2) ------------------------
    def stats_kernel(x_ref, w_ref, mask_ref, stats_ref):
        y = conv_image(x_ref, w_ref)
        msk = mask_ref[...]                                      # [m_out, 1]
        ym = y * msk
        s = jnp.sum(ym, axis=0, keepdims=True)                   # [1, cout_p]
        mean_i = s * (1.0 / m_img)
        d = (y - mean_i) * msk
        m2 = jnp.sum(d * d, axis=0, keepdims=True)               # [1, cout_p]
        stats_ref[0, 0:1] = s
        stats_ref[0, 1:2] = m2

    # ---- pass 2: recompute conv, fused scale/shift + ReLU, bf16 store ------
    def apply_kernel(x_ref, w_ref, scale_ref, shift_ref, o_ref):
        y = conv_image(x_ref, w_ref)
        o_ref[0] = jnp.maximum(y * scale_ref[...] + shift_ref[...],
                               0.0).astype(o_ref.dtype)

    x_spec = pl.BlockSpec((1, hw_pad, cin_p), lambda ni: (ni, 0, 0))
    w_spec = pl.BlockSpec((kk_cin, cout_p), lambda ni: (0, 0))
    row_spec = pl.BlockSpec((1, cout_p), lambda ni: (0, 0))
    mask_spec = pl.BlockSpec((m_out, 1), lambda ni: (0, 0))

    cparams = pltpu.CompilerParams(dimension_semantics=("parallel",),
                                   vmem_limit_bytes=VMEM_LIMIT)

    stats = pl.pallas_call(
        stats_kernel,
        out_shape=jax.ShapeDtypeStruct((n, 2, cout_p), jnp.float32),
        grid=(n,),
        in_specs=[x_spec, w_spec, mask_spec],
        out_specs=pl.BlockSpec((1, 2, cout_p), lambda ni: (ni, 0, 0)),
        compiler_params=cparams,
    )(x_flat, w_flat, mask)

    # ---- tiny cross-image reduction + BN folding (wrapper glue) ------------
    sums = stats[:, 0, :]                                        # [n, cout_p]
    m2s = stats[:, 1, :]
    mean_i = sums / m_img
    mean = jnp.sum(sums, axis=0) / m_tot
    m2 = jnp.sum(m2s, axis=0) + m_img * jnp.sum((mean_i - mean) ** 2, axis=0)
    var = jnp.maximum(m2 / m_tot, 0.0)                           # biased, like BN
    inv = jax.lax.rsqrt(var + EPS)

    pad_c = (0, cout_p - cout)
    gamma_p = jnp.pad(gamma.astype(jnp.float32), pad_c)
    beta_p = jnp.pad(beta.astype(jnp.float32), pad_c)
    # conv bias intentionally unused: it cancels exactly under BatchNorm.

    scale = gamma_p * inv
    shift = beta_p - mean * scale
    scale_row = scale.reshape(1, cout_p)
    shift_row = shift.reshape(1, cout_p)

    out_flat = pl.pallas_call(
        apply_kernel,
        out_shape=jax.ShapeDtypeStruct((n, m_out, cout_p), jnp.bfloat16),
        grid=(n,),
        in_specs=[x_spec, w_spec, row_spec, row_spec],
        out_specs=pl.BlockSpec((1, m_out, cout_p), lambda ni: (ni, 0, 0)),
        compiler_params=cparams,
    )(x_flat, w_flat, scale_row, shift_row)

    # Strip invalid full-width columns + channel padding; NHWC -> NCHW only to
    # match the PyTorch interface.
    # TODO(synk): keep NHWC/bf16 and skip this transpose if the consumer allows.
    out = out_flat.reshape(n, ho, w, cout_p)[:, :, :wo, :cout]
    return jnp.transpose(out, (0, 3, 1, 2)).astype(jnp.float32)


def _reference(x, weight, bias, gamma, beta):
    """Pure-JAX reference (conv operands in bf16 like the kernel's MXU feed)."""
    y = jax.lax.conv_general_dilated(
        x.astype(jnp.bfloat16), weight.astype(jnp.bfloat16),
        window_strides=(1, 1), padding="VALID",
        dimension_numbers=("NCHW", "OIHW", "NCHW"),
        preferred_element_type=jnp.float32)
    y = y + bias.reshape(1, -1, 1, 1).astype(jnp.float32)
    mean = jnp.mean(y, axis=(0, 2, 3), keepdims=True)
    var = jnp.mean(jnp.square(y - mean), axis=(0, 2, 3), keepdims=True)
    y = (y - mean) * jax.lax.rsqrt(var + EPS)
    y = y * gamma.reshape(1, -1, 1, 1) + beta.reshape(1, -1, 1, 1)
    return jnp.maximum(y, 0.0)


if __name__ == "__main__":
    # Small deterministic config: ConvLayer(in_channels=4, out_channels=8)
    N, Cin, H, W = 2, 4, 16, 16
    Cout, K = 8, 3

    key = jax.random.PRNGKey(0)
    kx, kwt, kb, kg, kbt = jax.random.split(key, 5)
    x = jax.random.normal(kx, (N, Cin, H, W), dtype=jnp.float32)
    weight = jax.random.normal(kwt, (Cout, Cin, K, K), dtype=jnp.float32) * 0.1
    bias = jax.random.normal(kb, (Cout,), dtype=jnp.float32) * 0.1
    gamma = 1.0 + 0.1 * jax.random.normal(kg, (Cout,), dtype=jnp.float32)
    beta = 0.1 * jax.random.normal(kbt, (Cout,), dtype=jnp.float32)

    out = conv_layer_forward(x, weight, bias, gamma, beta, kernel_size=K)
    out = jax.block_until_ready(out)

    ref = jax.block_until_ready(_reference(x, weight, bias, gamma, beta))
    assert out.shape == (N, Cout, H - K + 1, W - K + 1), out.shape
    max_err = float(jnp.max(jnp.abs(out - ref)))
    # Output is stored in bf16 (halves HBM write bytes), so allow
    # bf16-rounding-level differences against the f32 reference.
    assert jnp.allclose(out, ref, atol=2e-2, rtol=2e-2), max_err

    print("KERNEL_OK")
</pallas_src>

<mosaic_0001>
module attributes {stable_mosaic.version = 11 : i64} {
  func.func @stats_kernel(%arg0: i32, %arg1: memref<1x264x8xbf16, #tpu.memory_space<vmem>>, %arg2: memref<72x128xbf16, #tpu.memory_space<vmem>>, %arg3: memref<224x1xf32, #tpu.memory_space<vmem>>, %arg4: memref<1x2x128xf32, #tpu.memory_space<vmem>>) attributes {dimension_semantics = [#tpu.dimension_semantics<parallel>], iteration_bounds = array<i64: 2>, scalar_prefetch = 0 : i64, scratch_operands = 0 : i64, tpu.core_type = #tpu.core_type<tc>, window_params = [{transform_indices = @transform_0, window_bounds = array<i64: 1, 264, 8>}, {pipeline_mode = #tpu.pipeline_mode<synchronous>, transform_indices = @transform_1, window_bounds = array<i64: 72, 128>}, {pipeline_mode = #tpu.pipeline_mode<synchronous>, transform_indices = @transform_2, window_bounds = array<i64: 224, 1>}, {transform_indices = @transform_3, window_bounds = array<i64: 1, 2, 128>}]} {
    %c0 = arith.constant 0 : index
    %c0_0 = arith.constant 0 : index
    %c0_1 = arith.constant 0 : index
    %0 = vector.load %arg1[%c0, %c0_0, %c0_1] : memref<1x264x8xbf16, #tpu.memory_space<vmem>>, vector<1x224x8xbf16>
    %1 = vector.shape_cast %0 : vector<1x224x8xbf16> to vector<224x8xbf16>
    %c0_2 = arith.constant 0 : index
    %c1 = arith.constant 1 : index
    %c0_3 = arith.constant 0 : index
    %2 = vector.load %arg1[%c0_2, %c1, %c0_3] : memref<1x264x8xbf16, #tpu.memory_space<vmem>>, vector<1x224x8xbf16>
    %3 = vector.shape_cast %2 : vector<1x224x8xbf16> to vector<224x8xbf16>
    %c0_4 = arith.constant 0 : index
    %c2 = arith.constant 2 : index
    %c0_5 = arith.constant 0 : index
    %4 = vector.load %arg1[%c0_4, %c2, %c0_5] : memref<1x264x8xbf16, #tpu.memory_space<vmem>>, vector<1x224x8xbf16>
    %5 = vector.shape_cast %4 : vector<1x224x8xbf16> to vector<224x8xbf16>
    %c0_6 = arith.constant 0 : index
    %c16 = arith.constant 16 : index
    %c0_7 = arith.constant 0 : index
    %6 = vector.load %arg1[%c0_6, %c16, %c0_7] : memref<1x264x8xbf16, #tpu.memory_space<vmem>>, vector<1x224x8xbf16>
    %7 = vector.shape_cast %6 : vector<1x224x8xbf16> to vector<224x8xbf16>
    %c0_8 = arith.constant 0 : index
    %c17 = arith.constant 17 : index
    %c0_9 = arith.constant 0 : index
    %8 = vector.load %arg1[%c0_8, %c17, %c0_9] : memref<1x264x8xbf16, #tpu.memory_space<vmem>>, vector<1x224x8xbf16>
    %9 = vector.shape_cast %8 : vector<1x224x8xbf16> to vector<224x8xbf16>
    %c0_10 = arith.constant 0 : index
    %c18 = arith.constant 18 : index
    %c0_11 = arith.constant 0 : index
    %10 = vector.load %arg1[%c0_10, %c18, %c0_11] : memref<1x264x8xbf16, #tpu.memory_space<vmem>>, vector<1x224x8xbf16>
    %11 = vector.shape_cast %10 : vector<1x224x8xbf16> to vector<224x8xbf16>
    %c0_12 = arith.constant 0 : index
    %c32 = arith.constant 32 : index
    %c0_13 = arith.constant 0 : index
    %12 = vector.load %arg1[%c0_12, %c32, %c0_13] : memref<1x264x8xbf16, #tpu.memory_space<vmem>>, vector<1x224x8xbf16>
    %13 = vector.shape_cast %12 : vector<1x224x8xbf16> to vector<224x8xbf16>
    %c0_14 = arith.constant 0 : index
    %c33 = arith.constant 33 : index
    %c0_15 = arith.constant 0 : index
    %14 = vector.load %arg1[%c0_14, %c33, %c0_15] : memref<1x264x8xbf16, #tpu.memory_space<vmem>>, vector<1x224x8xbf16>
    %15 = vector.shape_cast %14 : vector<1x224x8xbf16> to vector<224x8xbf16>
    %c0_16 = arith.constant 0 : index
    %c34 = arith.constant 34 : index
    %c0_17 = arith.constant 0 : index
    %16 = vector.load %arg1[%c0_16, %c34, %c0_17] : memref<1x264x8xbf16, #tpu.memory_space<vmem>>, vector<1x224x8xbf16>
    %17 = vector.shape_cast %16 : vector<1x224x8xbf16> to vector<224x8xbf16>
    %18 = tpu.concatenate %1, %3, %5, %7, %9, %11, %13, %15, %17 in 1 : vector<224x8xbf16>, vector<224x8xbf16>, vector<224x8xbf16>, vector<224x8xbf16>, vector<224x8xbf16>, vector<224x8xbf16>, vector<224x8xbf16>, vector<224x8xbf16>, vector<224x8xbf16> -> vector<224x72xbf16>
    %c0_18 = arith.constant 0 : index
    %c0_19 = arith.constant 0 : index
    %19 = vector.load %arg2[%c0_18, %c0_19] : memref<72x128xbf16, #tpu.memory_space<vmem>>, vector<72x128xbf16>
    %cst = arith.constant dense<0.000000e+00> : vector<224x128xf32>
    %20 = tpu.matmul %18, %19, %cst {dimension_numbers = #tpu.dot_dimension_numbers<[1], [0], [0], [1], [0, 0, 1, 1], [], []>} : vector<224x72xbf16>, vector<72x128xbf16>, vector<224x128xf32> -> vector<224x128xf32>
    %c0_20 = arith.constant 0 : index
    %c0_21 = arith.constant 0 : index
    %21 = vector.load %arg3[%c0_20, %c0_21] : memref<224x1xf32, #tpu.memory_space<vmem>>, vector<224x1xf32>
    %22 = vector.broadcast %21 : vector<224x1xf32> to vector<224x128xf32>
    %23 = arith.mulf %20, %22 : vector<224x128xf32>
    %cst_22 = arith.constant dense<0.000000e+00> : vector<128xf32>
    %24 = vector.multi_reduction <add>, %23, %cst_22 [0] : vector<224x128xf32> to vector<128xf32>
    %25 = vector.shape_cast %24 : vector<128xf32> to vector<1x128xf32>
    %cst_23 = arith.constant 0.00510204071 : f32
    %26 = vector.broadcast %cst_23 : f32 to vector<1x128xf32>
    %27 = arith.mulf %25, %26 : vector<1x128xf32>
    %28 = vector.broadcast %27 : vector<1x128xf32> to vector<224x128xf32>
    %29 = arith.subf %20, %28 : vector<224x128xf32>
    %30 = vector.broadcast %21 : vector<224x1xf32> to vector<224x128xf32>
    %31 = arith.mulf %29, %30 : vector<224x128xf32>
    %32 = arith.mulf %31, %31 : vector<224x128xf32>
    %cst_24 = arith.constant dense<0.000000e+00> : vector<128xf32>
    %33 = vector.multi_reduction <add>, %32, %cst_24 [0] : vector<224x128xf32> to vector<128xf32>
    %34 = vector.shape_cast %33 : vector<128xf32> to vector<1x128xf32>
    %c0_25 = arith.constant 0 : index
    %c0_26 = arith.constant 0 : index
    %c0_27 = arith.constant 0 : index
    %35 = vector.load %arg4[%c0_25, %c0_26, %c0_27] : memref<1x2x128xf32, #tpu.memory_space<vmem>>, vector<1x1x128xf32>
    %36 = vector.shape_cast %35 : vector<1x1x128xf32> to vector<1x128xf32>
    %37 = vector.shape_cast %25 : vector<1x128xf32> to vector<1x1x128xf32>
    tpu.vector_store %arg4[%c0_25, %c0_26, %c0_27], %37 {strides = array<i32>} : memref<1x2x128xf32, #tpu.memory_space<vmem>>, vector<1x1x128xf32>,
    %c0_28 = arith.constant 0 : index
    %c1_29 = arith.constant 1 : index
    %c0_30 = arith.constant 0 : index
    %38 = vector.load %arg4[%c0_28, %c1_29, %c0_30] : memref<1x2x128xf32, #tpu.memory_space<vmem>>, vector<1x1x128xf32>
    %39 = vector.shape_cast %38 : vector<1x1x128xf32> to vector<1x128xf32>
    %40 = vector.shape_cast %34 : vector<1x128xf32> to vector<1x1x128xf32>
    tpu.vector_store %arg4[%c0_28, %c1_29, %c0_30], %40 {strides = array<i32>} : memref<1x2x128xf32, #tpu.memory_space<vmem>>, vector<1x1x128xf32>,
    return
  }
  func.func @transform_0(%arg0: i32) -> (i32, i32, i32) {
    %c0_i32 = arith.constant 0 : i32
    %c0_i32_0 = arith.constant 0 : i32
    %c0_i32_1 = arith.constant 0 : i32
    return %arg0, %c0_i32, %c0_i32_0 : i32, i32, i32
  }
  func.func @transform_1(%arg0: i32) -> (i32, i32) {
    %c0_i32 = arith.constant 0 : i32
    %c0_i32_0 = arith.constant 0 : i32
    %c0_i32_1 = arith.constant 0 : i32
    return %c0_i32, %c0_i32_0 : i32, i32
  }
  func.func @transform_2(%arg0: i32) -> (i32, i32) {
    %c0_i32 = arith.constant 0 : i32
    %c0_i32_0 = arith.constant 0 : i32
    %c0_i32_1 = arith.constant 0 : i32
    return %c0_i32, %c0_i32_0 : i32, i32
  }
  func.func @transform_3(%arg0: i32) -> (i32, i32, i32) {
    %c0_i32 = arith.constant 0 : i32
    %c0_i32_0 = arith.constant 0 : i32
    %c0_i32_1 = arith.constant 0 : i32
    return %arg0, %c0_i32, %c0_i32_0 : i32, i32, i32
  }
}

module attributes {stable_mosaic.version = 11 : i64} {
  func.func @apply_kernel(%arg0: i32, %arg1: memref<1x264x8xbf16, #tpu.memory_space<vmem>>, %arg2: memref<72x128xbf16, #tpu.memory_space<vmem>>, %arg3: memref<1x128xf32, #tpu.memory_space<vmem>>, %arg4: memref<1x128xf32, #tpu.memory_space<vmem>>, %arg5: memref<1x224x128xbf16, #tpu.memory_space<vmem>>) attributes {dimension_semantics = [#tpu.dimension_semantics<parallel>], iteration_bounds = array<i64: 2>, scalar_prefetch = 0 : i64, scratch_operands = 0 : i64, tpu.core_type = #tpu.core_type<tc>, window_params = [{transform_indices = @transform_0, window_bounds = array<i64: 1, 264, 8>}, {pipeline_mode = #tpu.pipeline_mode<synchronous>, transform_indices = @transform_1, window_bounds = array<i64: 72, 128>}, {pipeline_mode = #tpu.pipeline_mode<synchronous>, transform_indices = @transform_2, window_bounds = array<i64: 1, 128>}, {pipeline_mode = #tpu.pipeline_mode<synchronous>, transform_indices = @transform_3, window_bounds = array<i64: 1, 128>}, {transform_indices = @transform_4, window_bounds = array<i64: 1, 224, 128>}]} {
    %c0 = arith.constant 0 : index
    %c0_0 = arith.constant 0 : index
    %c0_1 = arith.constant 0 : index
    %0 = vector.load %arg1[%c0, %c0_0, %c0_1] : memref<1x264x8xbf16, #tpu.memory_space<vmem>>, vector<1x224x8xbf16>
    %1 = vector.shape_cast %0 : vector<1x224x8xbf16> to vector<224x8xbf16>
    %c0_2 = arith.constant 0 : index
    %c1 = arith.constant 1 : index
    %c0_3 = arith.constant 0 : index
    %2 = vector.load %arg1[%c0_2, %c1, %c0_3] : memref<1x264x8xbf16, #tpu.memory_space<vmem>>, vector<1x224x8xbf16>
    %3 = vector.shape_cast %2 : vector<1x224x8xbf16> to vector<224x8xbf16>
    %c0_4 = arith.constant 0 : index
    %c2 = arith.constant 2 : index
    %c0_5 = arith.constant 0 : index
    %4 = vector.load %arg1[%c0_4, %c2, %c0_5] : memref<1x264x8xbf16, #tpu.memory_space<vmem>>, vector<1x224x8xbf16>
    %5 = vector.shape_cast %4 : vector<1x224x8xbf16> to vector<224x8xbf16>
    %c0_6 = arith.constant 0 : index
    %c16 = arith.constant 16 : index
    %c0_7 = arith.constant 0 : index
    %6 = vector.load %arg1[%c0_6, %c16, %c0_7] : memref<1x264x8xbf16, #tpu.memory_space<vmem>>, vector<1x224x8xbf16>
    %7 = vector.shape_cast %6 : vector<1x224x8xbf16> to vector<224x8xbf16>
    %c0_8 = arith.constant 0 : index
    %c17 = arith.constant 17 : index
    %c0_9 = arith.constant 0 : index
    %8 = vector.load %arg1[%c0_8, %c17, %c0_9] : memref<1x264x8xbf16, #tpu.memory_space<vmem>>, vector<1x224x8xbf16>
    %9 = vector.shape_cast %8 : vector<1x224x8xbf16> to vector<224x8xbf16>
    %c0_10 = arith.constant 0 : index
    %c18 = arith.constant 18 : index
    %c0_11 = arith.constant 0 : index
    %10 = vector.load %arg1[%c0_10, %c18, %c0_11] : memref<1x264x8xbf16, #tpu.memory_space<vmem>>, vector<1x224x8xbf16>
    %11 = vector.shape_cast %10 : vector<1x224x8xbf16> to vector<224x8xbf16>
    %c0_12 = arith.constant 0 : index
    %c32 = arith.constant 32 : index
    %c0_13 = arith.constant 0 : index
    %12 = vector.load %arg1[%c0_12, %c32, %c0_13] : memref<1x264x8xbf16, #tpu.memory_space<vmem>>, vector<1x224x8xbf16>
    %13 = vector.shape_cast %12 : vector<1x224x8xbf16> to vector<224x8xbf16>
    %c0_14 = arith.constant 0 : index
    %c33 = arith.constant 33 : index
    %c0_15 = arith.constant 0 : index
    %14 = vector.load %arg1[%c0_14, %c33, %c0_15] : memref<1x264x8xbf16, #tpu.memory_space<vmem>>, vector<1x224x8xbf16>
    %15 = vector.shape_cast %14 : vector<1x224x8xbf16> to vector<224x8xbf16>
    %c0_16 = arith.constant 0 : index
    %c34 = arith.constant 34 : index
    %c0_17 = arith.constant 0 : index
    %16 = vector.load %arg1[%c0_16, %c34, %c0_17] : memref<1x264x8xbf16, #tpu.memory_space<vmem>>, vector<1x224x8xbf16>
    %17 = vector.shape_cast %16 : vector<1x224x8xbf16> to vector<224x8xbf16>
    %18 = tpu.concatenate %1, %3, %5, %7, %9, %11, %13, %15, %17 in 1 : vector<224x8xbf16>, vector<224x8xbf16>, vector<224x8xbf16>, vector<224x8xbf16>, vector<224x8xbf16>, vector<224x8xbf16>, vector<224x8xbf16>, vector<224x8xbf16>, vector<224x8xbf16> -> vector<224x72xbf16>
    %c0_18 = arith.constant 0 : index
    %c0_19 = arith.constant 0 : index
    %19 = vector.load %arg2[%c0_18, %c0_19] : memref<72x128xbf16, #tpu.memory_space<vmem>>, vector<72x128xbf16>
    %cst = arith.constant dense<0.000000e+00> : vector<224x128xf32>
    %20 = tpu.matmul %18, %19, %cst {dimension_numbers = #tpu.dot_dimension_numbers<[1], [0], [0], [1], [0, 0, 1, 1], [], []>} : vector<224x72xbf16>, vector<72x128xbf16>, vector<224x128xf32> -> vector<224x128xf32>
    %c0_20 = arith.constant 0 : index
    %c0_21 = arith.constant 0 : index
    %21 = vector.load %arg3[%c0_20, %c0_21] : memref<1x128xf32, #tpu.memory_space<vmem>>, vector<1x128xf32>
    %22 = vector.broadcast %21 : vector<1x128xf32> to vector<224x128xf32>
    %23 = arith.mulf %20, %22 : vector<224x128xf32>
    %c0_22 = arith.constant 0 : index
    %c0_23 = arith.constant 0 : index
    %24 = vector.load %arg4[%c0_22, %c0_23] : memref<1x128xf32, #tpu.memory_space<vmem>>, vector<1x128xf32>
    %25 = vector.broadcast %24 : vector<1x128xf32> to vector<224x128xf32>
    %26 = arith.addf %23, %25 : vector<224x128xf32>
    %cst_24 = arith.constant 0.000000e+00 : f32
    %27 = vector.broadcast %cst_24 : f32 to vector<224x128xf32>
    %28 = arith.maximumf %26, %27 : vector<224x128xf32>
    %29 = arith.truncf %28 : vector<224x128xf32> to vector<224x128xbf16>
    %c0_25 = arith.constant 0 : index
    %c0_26 = arith.constant 0 : index
    %c0_27 = arith.constant 0 : index
    %30 = vector.load %arg5[%c0_25, %c0_26, %c0_27] : memref<1x224x128xbf16, #tpu.memory_space<vmem>>, vector<1x224x128xbf16>
    %31 = vector.shape_cast %30 : vector<1x224x128xbf16> to vector<224x128xbf16>
    %32 = vector.shape_cast %29 : vector<224x128xbf16> to vector<1x224x128xbf16>
    tpu.vector_store %arg5[%c0_25, %c0_26, %c0_27], %32 {strides = array<i32>} : memref<1x224x128xbf16, #tpu.memory_space<vmem>>, vector<1x224x128xbf16>,
    return
  }
  func.func @transform_0(%arg0: i32) -> (i32, i32, i32) {
    %c0_i32 = arith.constant 0 : i32
    %c0_i32_0 = arith.constant 0 : i32
    %c0_i32_1 = arith.constant 0 : i32
    return %arg0, %c0_i32, %c0_i32_0 : i32, i32, i32
  }
  func.func @transform_1(%arg0: i32) -> (i32, i32) {
    %c0_i32 = arith.constant 0 : i32
    %c0_i32_0 = arith.constant 0 : i32
    %c0_i32_1 = arith.constant 0 : i32
    return %c0_i32, %c0_i32_0 : i32, i32
  }
  func.func @transform_2(%arg0: i32) -> (i32, i32) {
    %c0_i32 = arith.constant 0 : i32
    %c0_i32_0 = arith.constant 0 : i32
    %c0_i32_1 = arith.constant 0 : i32
    return %c0_i32, %c0_i32_0 : i32, i32
  }
  func.func @transform_3(%arg0: i32) -> (i32, i32) {
    %c0_i32 = arith.constant 0 : i32
    %c0_i32_0 = arith.constant 0 : i32
    %c0_i32_1 = arith.constant 0 : i32
    return %c0_i32, %c0_i32_0 : i32, i32
  }
  func.func @transform_4(%arg0: i32) -> (i32, i32, i32) {
    %c0_i32 = arith.constant 0 : i32
    %c0_i32_0 = arith.constant 0 : i32
    %c0_i32_1 = arith.constant 0 : i32
    return %arg0, %c0_i32, %c0_i32_0 : i32, i32, i32
  }
}

</mosaic_0001>

<bundles_post_ra>
// kernel: conv_layer_forward.3
= control target key start
LH: loop header
LB: loop body
LE: loop exit
PB: predicated region body
PF: predicated region fallthrough
CT: control target
= control target key end

     0   :  { %s1617_s15 = smov 0   ;;  %s2388_s0 = inlined_call_operand.vmem [shape: bf16[2,264,8], index: 0, kind: input, shape index: {}]   ;;  %s2389_s1 = inlined_call_operand.vmem [shape: bf16[72,128], index: 1, kind: input, shape index: {}]   ;;  %s2390_s2 = inlined_call_operand.vmem [shape: f32[1,128], index: 2, kind: input, shape index: {}]   ;;  %s2391_s3 = inlined_call_operand.vmem [shape: f32[1,128], index: 3, kind: input, shape index: {}]   ;;  %s2392_s4 = inlined_call_operand.vmem [shape: bf16[2,224,128], index: 4, kind: output, shape index: {}]  }
   0x1 LB: > { %s1327_s16 = sadd.s32 4294967295, %s1582_s15   ;;  %p1331_p0 = scmp.ge.s32.totalorder %s1582_s15, 1  ;;  %s1582_s15 = sphi %s1617_s15, %s14_s15  }
   0x2   : > { %p162_p1 = scmp.lt.s32.totalorder %s1582_s15, 3 }
   0x4   : > { %p163_p2 = pnand %p1331_p0, %p162_p1 }
   0x5   : > { %p188_p3 = scmp.lt.s32.totalorder (!%p163_p2), %s1327_s16, 1  ;;  %s1584_s21 = smov (!%p163_p2), 8  }
   0x6   : > { %166 = sbr.rel (%p163_p2) target bundleno = 578 (0x242), region = 36  ;;  %s1585_s22 = smov (!%p163_p2), 16  }
   0x7   : > { %s1586_s23 = smov (!%p163_p2), 24   ;;  %s1587_s24 = smov (!%p163_p2), 40  }
   0x8   : > { %s1588_s25 = smov (!%p163_p2), 32   ;;  %s1589_s26 = smov (!%p163_p2), 48  }
   0x9   : > { %s1590_s27 = smov (!%p163_p2), 64   ;;  %s1591_s28 = smov (!%p163_p2), 56  }
   0xb   : > { %s2394_s16 = smov (!%p188_p3, %s1327_s16), 1  ;;  %vm310_vm0 = vsmask.f32 7424  ;;  %vm458_vm1 = vcmask 1046528   ;;  %vm744_vm2 = vcmask 64512   ;;  %vm773_vm3 = vcmask 130048  }
   0xc   : > { %s1556_s17 = smul.u32 132, %s2394_s16  ;;  %vm1041_vm4 = vcmask 1043456   ;;  %vm802_vm5 = vcmask 195584   ;;  %vm831_vm6 = vcmask 261120   ;;  %vm860_vm7 = vcmask 326656  }
   0xd   : > { %vm889_vm8 = vcmask 392192   ;;  %vm918_vm9 = vcmask 457728   ;;  %vm947_vm10 = vcmask 523264   ;;  %vm1012_vm11 = vcmask 588800   ;;  %s1557_s19 = smul.u32 112, %s2394_s16 }
   0xe   : > { %s1631_s20 = scalar_lea.vmem %s2388_s0, %s1556_s17 }
   0xf   : > { %v1634_v0 = vld [vmem:[%s1631_s20 + $0x10] sm:$0xff]   ;;  %v1637_v1 = vld [vmem:[%s1631_s20 + $0x18] sm:$0xff]  ;;  %v1640_v2 = vld [vmem:[%s1631_s20] sm:$0xff]  }
  0x10   : > { %v327_v3 = vshll.u32 %v1634_v0, 16  ;;  %v331_v4 = vshrl.u32 %v1634_v0, 16  ;;  %v1645_v5 = vld [vmem:[%s1631_s20 + $0x8] sm:$0xff]   ;;  %v312_v6 = vshrl.u32 %v1640_v2, 16  ;;  %v314_v7 = vshll.u32 %v1640_v2, 16  ;;  %v1650_v8 = vld [vmem:[%s1631_s20 + $0x20] sm:$0xff] }
  0x11   : > { %v335_v9 = vshll.u32 %v1637_v1, 16  ;;  %v319_v10 = vshll.u32 %v1645_v5, 16  ;;  %v1655_v11 = vld [vmem:[%s1631_s20 + $0x28] sm:$0xff]  ;;  %v343_v14 = vshll.u32 %v1650_v8, 16  ;;  %v347_v15 = vshrl.u32 %v1650_v8, 16  ;;  %v1660_v16 = vld [vmem:[%s1631_s20 + $0x30] sm:$0xff] }
  0x12   : > { %v329_v12 = vrot.slane %v327_v3, 1  ;;  %v316_v13 = vrot.slane %v314_v7, 1  ;;  %v351_v19 = vshll.u32 %v1655_v11, 16  ;;  %v339_v20 = vshrl.u32 %v1637_v1, 16  ;;  %v1666_v25 = vld [vmem:[%s1631_s20 + $0x38] sm:$0xff]  ;;  %v1675_v32 = vld [vmem:[%s1631_s20 + $0x40] sm:$0xff] }
  0x13   : > { %v337_v17 = vrot.slane %v335_v9, 1  ;;  %v321_v18 = vrot.slane %v319_v10, 1  ;;  %v345_v23 = vrot.slane %v343_v14, 1  ;;  %v323_v24 = vshrl.u32 %v1645_v5, 16  ;;  %v1688_v40 = vld [vmem:[%s1631_s20 + $0x48] sm:$0xff]  ;;  %v1694_v42 = vld [vmem:[%s1631_s20 + $0x50] sm:$0xff] }
  0x14   : > { %v333_v21 = vor.u32 %v331_v4, %v329_v12  ;;  %v317_v22 = vor.u32 %v316_v13, %v312_v6  ;;  %v353_v26 = vrot.slane %v351_v19, 1  ;;  %v355_v27 = vshrl.u32 %v1655_v11, 16  ;;  %v1707_v51 = vld [vmem:[%s1631_s20 + $0x58] sm:$0xff]  ;;  %v227_v55 = vld [vmem:[%s1631_s20 + $0x70] sm:$0x1]  ;;  %v1719_v59 = vld [vmem:[%s1631_s20 + $0x60] sm:$0xff] }
  0x15   : > { %v349_v30 = vor.u32 %v347_v15, %v345_v23  ;;  %v359_v31 = vshll.u32 %v1660_v16, 16  ;;  %v341_v33 = vor.u32 %v339_v20, %v337_v17  ;;  %v325_v35 = vor.u32 %v323_v24, %v321_v18  ;;  %v1730_v4 = vld [vmem:[%s1631_s20 + $0x68] sm:$0xff] }
  0x16   : > { %v1670_v28 = vsel %vm310_vm0, %v333_v21, %v337_v17  ;;  %v322_v29 = vsel %vm310_vm0, %v317_v22, %v321_v18  ;;  %v367_v36 = vshll.u32 %v1666_v25, 16  ;;  %v357_v37 = vor.u32 %v355_v27, %v353_v26  ;;  %v1519_v22 = vld [vmem:[%s1631_s20] sm:$0xf0] }
  0x17   : > { %431 = vrot.lane.b32.xlu1 %v1670_v28, %s1584_s21  ;;  %427 = vrot.lane.b32.xlu0 %v322_v29, %s1584_s21  ;;  %v1681_v34 = vsel %vm310_vm0, %v349_v30, %v353_v26  ;;  %v361_v38 = vrot.slane %v359_v31, 1  ;;  %v375_v39 = vshll.u32 %v1675_v32, 16  ;;  %v1691_v41 = vsel %vm310_vm0, %v341_v33, %v345_v23  ;;  %v1520_v23 = vld [vmem:[%s1631_s20] sm:$0xe] }
  0x18   : > { %435 = vrot.lane.b32.xlu2 %v1681_v34, %s1584_s21  ;;  %v1697_v43 = vsel %vm310_vm0, %v325_v35, %v329_v12  ;;  %v369_v44 = vrot.slane %v367_v36, 1  ;;  %v371_v45 = vshrl.u32 %v1666_v25, 16  ;;  %v363_v46 = vshrl.u32 %v1660_v16, 16 }
  0x19   : > { %v1702_v47 = vsel %vm310_vm0, %v357_v37, %v361_v38  ;;  %v377_v48 = vrot.slane %v375_v39, 1  ;;  %v379_v49 = vshrl.u32 %v1675_v32, 16  ;;  %v383_v50 = vshll.u32 %v1688_v40, 16 }
  0x1a   : > { %v391_v52 = vshll.u32 %v1694_v42, 16  ;;  %v373_v53 = vor.u32 %v371_v45, %v369_v44  ;;  %v365_v54 = vor.u32 %v363_v46, %v361_v38  ;;  %v399_v58 = vshll.u32 %v1707_v51, 16 }
  0x1b   : > { %v381_v56 = vor.u32 %v379_v49, %v377_v48  ;;  %v385_v57 = vrot.slane %v383_v50, 1  ;;  %v395_v61 = vshrl.u32 %v1694_v42, 16  ;;  %v387_v3 = vshrl.u32 %v1688_v40, 16 }
  0x1c   : > { %v393_v60 = vrot.slane %v391_v52, 1  ;;  %v1723_v62 = vsel %vm310_vm0, %v373_v53, %v377_v48  ;;  %v1726_v63 = vsel %vm310_vm0, %v365_v54, %v369_v44  ;;  %v308_v6 = vunpack.c.l.b16 %v227_v55 }
  0x1d   : > { %v1733_v7 = vsel %vm310_vm0, %v381_v56, %v385_v57  ;;  %v401_v9 = vrot.slane %v399_v58, 1  ;;  %v403_v10 = vshrl.u32 %v1707_v51, 16  ;;  %v407_v12 = vshll.u32 %v1719_v59, 16 }
  0x1e   : > { %v397_v13 = vor.u32 %v395_v61, %v393_v60  ;;  %v389_v14 = vor.u32 %v387_v3, %v385_v57  ;;  %v1741_v15 = vpack.c.b16 %v308_v6, %v308_v6  ;;  %v415_v17 = vshll.u32 %v1730_v4, 16 }
  0x1f   : > { %433 = vrot.lane.b32.xlu1 %v1691_v41, %s1584_s21  ;;  %429 = vrot.lane.b32.xlu0 %v1697_v43, %s1584_s21  ;;  %v405_v18 = vor.u32 %v403_v10, %v401_v9  ;;  %v409_v19 = vrot.slane %v407_v12, 1  ;;  %v419_v21 = vshrl.u32 %v1730_v4, 16  ;;  %v411_v29 = vshrl.u32 %v1719_v59, 16 }
  0x20   : > { %437 = vrot.lane.b32.xlu2 %v1702_v47, %s1584_s21  ;;  %v1747_v20 = vsel %vm310_vm0, %v397_v13, %v401_v9  ;;  %v1753_v24 = vsel %vm310_vm0, %v389_v14, %v393_v60  ;;  %v417_v26 = vrot.slane %v415_v17, 1  ;;  %v423_v27 = vshll.u32 %v1741_v15, 16 }
  0x21   : > { %v1758_v30 = vsel %vm310_vm0, %v405_v18, %v409_v19  ;;  %v1521_v31 = vor.u32 %v1520_v23, %v1519_v22  ;;  %v413_v36 = vor.u32 %v411_v29, %v409_v19  ;;  %v460_v38 = vrot.slane %v1645_v5, 1 }
  0x22   : > { %v1764_v33 = vor.u32 %v419_v21, %v417_v26  ;;  %v425_v35 = vrot.slane %v423_v27, 1  ;;  %v1779_v46 = vrot.slane %v1634_v0, 1  ;;  %v1782_v48 = vrot.slane %v1637_v1, 1 }
  0x23   : > { %v459_v37 = vrot.slane %v1521_v31, 1  ;;  %v1772_v44 = vsel %vm310_vm0, %v413_v36, %v417_v26  ;;  %v466_v49 = vrot.slane %v1650_v8, 1  ;;  %v468_v54 = vrot.slane %v1655_v11, 1 }
  0x24   : > { %v426_v39 = vsel %vm310_vm0, %v1764_v33, %v425_v35  ;;  %v1789_v50 = vsel %vm458_vm1, %v1779_v46, %v1782_v48  ;;  %v463_v52 = vsel %vm458_vm1, %v460_v38, %v1779_v46  ;;  %v470_v55 = vrot.slane %v1660_v16, 1 }
  0x25   : > { %v461_v45 = vsel %vm458_vm1, %v459_v37, %v460_v38  ;;  %v1795_v53 = vsel %vm458_vm1, %v1782_v48, %v466_v49  ;;  %v472_v56 = vrot.slane %v1666_v25, 1  ;;  %v1809_v58 = vsel %vm458_vm1, %v466_v49, %v468_v54 }
  0x26   : > { %v1806_v57 = vsel %vm458_vm1, %v468_v54, %v470_v55  ;;  %v474_v61 = vrot.slane %v1675_v32, 1  ;;  %v476_v3 = vrot.slane %v1688_v40, 1  ;;  %v478_v6 = vrot.slane %v1694_v42, 1 }
  0x27   : > { %441 = vrot.lane.b32.xlu1 %v1723_v62, %s1584_s21  ;;  %439 = vrot.lane.b32.xlu0 %v1726_v63, %s1584_s21  ;;  %v1812_v60 = vsel %vm458_vm1, %v470_v55, %v472_v56  ;;  %v480_v13 = vrot.slane %v1707_v51, 1  ;;  %v482_v14 = vrot.slane %v1719_v59, 1  ;;  %v1838_v17 = vrot.slane %v1730_v4, 1 }
  0x28   : > { %443 = vrot.lane.b32.xlu2 %v1733_v7, %s1584_s21  ;;  %v1824_v9 = vsel %vm458_vm1, %v474_v61, %v476_v3  ;;  %v1827_v10 = vsel %vm458_vm1, %v472_v56, %v474_v61  ;;  %v479_v12 = vsel %vm458_vm1, %v476_v3, %v478_v6  ;;  %v486_v22 = vrot.slane %v1741_v15, 1 }
  0x29   : > { %v1841_v18 = vsel %vm458_vm1, %v480_v13, %v482_v14  ;;  %v1844_v19 = vsel %vm458_vm1, %v478_v6, %v480_v13  ;;  %v1848_v21 = vsel %vm458_vm1, %v482_v14, %v1838_v17 }
  0x2a   : > { %v487_v23 = vsel %vm458_vm1, %v1838_v17, %v486_v22 }
  0x2f   : > { %447 = vrot.lane.b32.xlu1 %v1747_v20, %s1584_s21  ;;  %445 = vrot.lane.b32.xlu0 %v1753_v24, %s1584_s21 }
  0x30   : > { %449 = vrot.lane.b32.xlu2 %v1758_v30, %s1584_s21 }
  0x37   : > { %453 = vrot.lane.b32.xlu1 %v426_v39, %s1584_s21  ;;  %451 = vrot.lane.b32.xlu0 %v1772_v44, %s1584_s21 }
  0x38   : > { %488 = vrot.lane.b32.xlu2 %v461_v45, %s1585_s22  ;;  %v1914_v45 = vld [vmem:[%s1631_s20 + $0x70] sm:$0xff] }
  0x39   : > { %v553_v56 = vshll.u32 %v1914_v45, 16  ;;  %v1950_v22 = vrot.slane %v1914_v45, 1 }
  0x3f   : > { %492 = vrot.lane.b32.xlu1 %v1789_v50, %s1585_s22  ;;  %490 = vrot.lane.b32.xlu0 %v463_v52, %s1585_s22 }
  0x40   : > { %494 = vrot.lane.b32.xlu2 %v1795_v53, %s1585_s22 }
  0x47   : > { %498 = vrot.lane.b32.xlu1 %v1806_v57, %s1585_s22  ;;  %496 = vrot.lane.b32.xlu0 %v1809_v58, %s1585_s22 }
  0x48   : > { %500 = vrot.lane.b32.xlu2 %v1812_v60, %s1585_s22 }
  0x4f   : > { %504 = vrot.lane.b32.xlu1 %v1824_v9, %s1585_s22  ;;  %502 = vrot.lane.b32.xlu0 %v1827_v10, %s1585_s22 }
  0x50   : > { %506 = vrot.lane.b32.xlu2 %v479_v12, %s1585_s22 }
  0x57   : > { %510 = vrot.lane.b32.xlu1 %v1841_v18, %s1585_s22  ;;  %508 = vrot.lane.b32.xlu0 %v1844_v19, %s1585_s22 }
  0x58   : > { %512 = vrot.lane.b32.xlu2 %v1848_v21, %s1585_s22 }
  0x5f   : > { %521 = vrot.lane.b32.xlu1 %v1645_v5, %s1586_s23  ;;  %514 = vrot.lane.b32.xlu0 %v487_v23, %s1585_s22  ;;  %s2286_s22 = scalar_lea.vmem %s2392_s4, %s1557_s19 }
  0x60   : > { %523 = vrot.lane.b32.xlu2 %v1634_v0, %s1586_s23 }
  0x67   : > { %527 = vrot.lane.b32.xlu1 %v1650_v8, %s1586_s23  ;;  %525 = vrot.lane.b32.xlu0 %v1637_v1, %s1586_s23 }
  0x68   : > { %535 = vrot.lane.b32.xlu2 %v1675_v32, %s1586_s23 }
  0x6f   : > { %616 = vrot.lane.b32.xlu1 %v1824_v9, %s1587_s24  ;;  %579 = vrot.lane.b32.xlu0 %v1733_v7, %s1588_s25 }
  0x70   : > { %649 = vrot.lane.b32.xlu2 %v1688_v40, %s1589_s26 }
  0x72   : > { %v436_v15 = vpop.permute.xlu2 %435 }
  0x73   : > { %v1878_v26 = vsel %vm744_vm2, %v1650_v8, %v436_v15 }
  0x77   : > { %730 = vrot.lane.b32.xlu1 %v479_v12, %s1590_s27  ;;  %693 = vrot.lane.b32.xlu0 %v1753_v24, %s1591_s28 }
  0x78   : > { %571 = vrot.lane.b32.xlu2 %v1681_v34, %s1588_s25 }
  0x7a   : > { %v438_v27 = vpop.permute.xlu2 %437 }
  0x7b   : > { %v1887_v29 = vsel %vm744_vm2, %v1655_v11, %v438_v27  ;;  %v1522_v27 = vld [vmem:[%s1631_s20 + $0x8] sm:$0xf0] }
  0x7f   : > { %641 = vrot.lane.b32.xlu1 %v1655_v11, %s1589_s26  ;;  %608 = vrot.lane.b32.xlu0 %v1809_v58, %s1587_s24 }
  0x80   : > { %685 = vrot.lane.b32.xlu2 %v1702_v47, %s1591_s28 }
  0x82   : > { %v1895_v31 = vpop.permute.xlu2 %443 }
  0x87   : > { %537 = vrot.lane.b32.xlu1 %v1688_v40, %s1586_s23  ;;  %722 = vrot.lane.b32.xlu0 %v1806_v57, %s1590_s27 }
  0x88   : > { %543 = vrot.lane.b32.xlu2 %v1719_v59, %s1586_s23 }
  0x89   : > { %v432_v35 = vpop.permute.xlu1 %431  ;;  %v428_v36 = vpop.permute.xlu0 %427 }
  0x8a   : > { %v750_v37 = vsel %vm744_vm2, %v1634_v0, %v432_v35  ;;  %v746_v38 = vsel %vm744_vm2, %v1640_v2, %v428_v36  ;;  %v1907_v39 = vpop.permute.xlu2 %449  ;;  %v1523_v35 = vld [vmem:[%s1631_s20 + $0x8] sm:$0xe] }
  0x8f   : > { %587 = vrot.lane.b32.xlu1 %v1772_v44, %s1588_s25  ;;  %581 = vrot.lane.b32.xlu0 %v1753_v24, %s1588_s25  ;;  %v1927_v24 = vrot.slane %v553_v56, 1 }
  0x90   : > { %618 = vrot.lane.b32.xlu2 %v479_v12, %s1587_s24 }
  0x91   : > { %v434_v49 = vpop.permute.xlu1 %433  ;;  %v430_v52 = vpop.permute.xlu0 %429  ;;  %v1943_v14 = vsel %vm310_vm0, %v1764_v33, %v1927_v24 }
  0x92   : > { %v748_v54 = vsel %vm744_vm2, %v1645_v5, %v430_v52  ;;  %v489_v55 = vpop.permute.xlu2 %488  ;;  %v752_v61 = vsel %vm744_vm2, %v1637_v1, %v434_v49  ;;  %v1968_v52 = vsel %vm458_vm1, %v1838_v17, %v1950_v22 }
  0x93   : > { %v1920_v2 = vsel %vm773_vm3, %v746_v38, %v489_v55  ;;  %v1524_v55 = vor.u32 %v1523_v35, %v1522_v27  ;;  %v1526_v27 = vld [vmem:[%s1631_s20 + $0x10] sm:$0xe] }
  0x95   : > { %v596_v56 = vrot.slane %v1524_v55, 1 }
  0x97   : > { %651 = vrot.lane.b32.xlu1 %v1694_v42, %s1589_s26  ;;  %624 = vrot.lane.b32.xlu0 %v1848_v21, %s1587_s24 }
  0x98   : > { %657 = vrot.lane.b32.xlu2 %v1730_v4, %s1589_s26 }
  0x99   : > { %v1931_v5 = vpop.permute.xlu1 %441  ;;  %v440_v3 = vpop.permute.xlu0 %439 }
  0x9a   : > { %v758_v6 = vsel %vm744_vm2, %v1660_v16, %v440_v3  ;;  %v495_v12 = vpop.permute.xlu2 %494 }
  0x9b   : > { %v1938_v13 = vsel %vm773_vm3, %v752_v61, %v495_v12  ;;  %v597_v12 = vsel %vm458_vm1, %v596_v56, %v1779_v46 }
  0x9f   : > { %701 = vrot.lane.b32.xlu1 %v1943_v14, %s1591_s28  ;;  %695 = vrot.lane.b32.xlu0 %v1747_v20, %s1591_s28 }
  0xa0   : > { %732 = vrot.lane.b32.xlu2 %v1844_v19, %s1590_s27 }
  0xa1   : > { %v448_v23 = vpop.permute.xlu1 %447  ;;  %v446_v15 = vpop.permute.xlu0 %445 }
  0xa2   : > { %v1958_v33 = vsel %vm744_vm2, %v1694_v42, %v448_v23  ;;  %v764_v36 = vsel %vm744_vm2, %v1688_v40, %v446_v15  ;;  %v501_v38 = vpop.permute.xlu2 %500  ;;  %v1525_v15 = vld [vmem:[%s1631_s20 + $0x10] sm:$0xf0] }
  0xa3   : > { %v1963_v49 = vsel %vm773_vm3, %v758_v6, %v501_v38  ;;  %v1527_v55 = vor.u32 %v1526_v27, %v1525_v15 }
  0xa7   : > { %529 = vrot.lane.b32.xlu1 %v1655_v11, %s1586_s23  ;;  %738 = vrot.lane.b32.xlu0 %v1968_v52, %s1590_s27 }
  0xa8   : > { %565 = vrot.lane.b32.xlu2 %v1697_v43, %s1588_s25 }
  0xa9   : > { %v454_v40 = vpop.permute.xlu1 %453  ;;  %v452_v61 = vpop.permute.xlu0 %451 }
  0xaa   : > { %v1978_v3 = vsel %vm744_vm2, %v1730_v4, %v454_v40  ;;  %v770_v17 = vsel %vm744_vm2, %v1719_v59, %v452_v61  ;;  %v507_v6 = vpop.permute.xlu2 %506 }
  0xab   : > { %v1983_v11 = vsel %vm773_vm3, %v764_v36, %v507_v6 }
  0xaf   : > { %602 = vrot.lane.b32.xlu1 %v597_v12, %s1587_s24  ;;  %573 = vrot.lane.b32.xlu0 %v1702_v47, %s1588_s25  ;;  %v984_v47 = vld [vmem:[%s2389_s1 + $0x20] sm:$0xf]  ;;  %v1434_v12 = vld [vmem:[%s2389_s1 + $0x18] sm:$0xff] }
  0xb0   : > { %610 = vrot.lane.b32.xlu2 %v1806_v57, %s1587_s24  ;;  %v1002_v56 = vunpack.c.l.b16 %v984_v47 }
  0xb1   : > { %v493_v43 = vpop.permute.xlu1 %492  ;;  %v491_v23 = vpop.permute.xlu0 %490 }
  0xb2   : > { %v1995_v35 = vsel %vm773_vm3, %v750_v37, %v493_v43  ;;  %v777_v36 = vsel %vm773_vm3, %v748_v54, %v491_v23  ;;  %v513_v38 = vpop.permute.xlu2 %512  ;;  %v1007_v57 = vpack.c.b16 %v1002_v56, %v1002_v56  ;;  %v710_v37 = vrot.slane %v1527_v55, 1 }
  0xb3   : > { %v1999_v46 = vsel %vm773_vm3, %v770_v17, %v513_v38  ;;  %v762_v23 = vsel %vm744_vm2, %v1675_v32, %v1895_v31  ;;  %v1432_v38 = vld [vmem:[%s2389_s1 + $0x8] sm:$0xff]  ;;  %v1431_v31 = vld [vmem:[%s2389_s1] sm:$0xff]  ;;  %v768_v55 = vsel %vm744_vm2, %v1707_v51, %v1907_v39 }
  0xb4   : > { %v1043_v61 = vsel %vm1041_vm4, %v1007_v57, 0 }
  0xb5   : > { %1542 = vmatpush.bf16.msra.mxu2 %v1043_v61  ;;  %1541 = vmatpush.bf16.msra.mxu1 %v1043_v61 }
  0xb6   : > { %1543 = vmatpush.bf16.msra.mxu3 %v1043_v61  ;;  %1048 = vmatpush.bf16.msra.mxu0 %v1043_v61 }
  0xb7   : > { %643 = vrot.lane.b32.xlu1 %v1660_v16, %s1589_s26  ;;  %635 = vrot.lane.b32.xlu0 %v1634_v0, %s1589_s26 }
  0xb8   : > { %679 = vrot.lane.b32.xlu2 %v1670_v28, %s1591_s28 }
  0xb9   : > { %v499_v54 = vpop.permute.xlu1 %498  ;;  %v497_v40 = vpop.permute.xlu0 %496  ;;  %1545 = vmatpush.bf16.msra.mxu2 %v1434_v12  ;;  %1544 = vmatpush.bf16.msra.mxu1 %v1434_v12 }
  0xba   : > { %v2012_v17 = vsel %vm773_vm3, %v1887_v29, %v499_v54  ;;  %v2016_v6 = vsel %vm773_vm3, %v1878_v26, %v497_v40  ;;  %v524_v0 = vpop.permute.xlu2 %523  ;;  %v711_v29 = vsel %vm458_vm1, %v710_v37, %v1782_v48  ;;  %v1433_v26 = vld [vmem:[%s2389_s1 + $0x10] sm:$0xff]  ;;  %1546 = vmatpush.bf16.msra.mxu3 %v1434_v12  ;;  %1049 = vmatpush.bf16.msra.mxu0 %v1434_v12 }
  0xbb   : > { %v2022_v43 = vsel %vm802_vm5, %v777_v36, %v524_v0 }
  0xbd   : > { %1548 = vmatpush.bf16.msra.mxu2 %v1433_v26  ;;  %1547 = vmatpush.bf16.msra.mxu1 %v1433_v26 }
  0xbe   : > { %1549 = vmatpush.bf16.msra.mxu3 %v1433_v26  ;;  %1050 = vmatpush.bf16.msra.mxu0 %v1433_v26 }
  0xbf   : > { %716 = vrot.lane.b32.xlu1 %v711_v29, %s1590_s27  ;;  %687 = vrot.lane.b32.xlu0 %v1726_v63, %s1591_s28 }
  0xc0   : > { %724 = vrot.lane.b32.xlu2 %v1812_v60, %s1590_s27 }
  0xc1   : > { %v505_v15 = vpop.permute.xlu1 %504  ;;  %v503_v48 = vpop.permute.xlu0 %502  ;;  %1551 = vmatpush.bf16.msra.mxu2 %v1432_v38  ;;  %1550 = vmatpush.bf16.msra.mxu1 %v1432_v38 }
  0xc2   : > { %v2038_v27 = vsel %vm773_vm3, %v762_v23, %v505_v15  ;;  %v536_v36 = vpop.permute.xlu2 %535  ;;  %1552 = vmatpush.bf16.msra.mxu3 %v1432_v38  ;;  %1051 = vmatpush.bf16.msra.mxu0 %v1432_v38 }
  0xc5   : > { %1554 = vmatpush.bf16.msra.mxu2 %v1431_v31  ;;  %1553 = vmatpush.bf16.msra.mxu1 %v1431_v31 }
  0xc6   : > { %1555 = vmatpush.bf16.msra.mxu3 %v1431_v31  ;;  %1052 = vmatpush.bf16.msra.mxu0 %v1431_v31 }
  0xc7   : > { %545 = vrot.lane.b32.xlu1 %v1730_v4, %s1586_s23  ;;  %539 = vrot.lane.b32.xlu0 %v1694_v42, %s1586_s23 }
  0xc8   : > { %583 = vrot.lane.b32.xlu2 %v1747_v20, %s1588_s25  ;;  %v2067_v20 = vld [vmem:[%s1631_s20 + $0x78] sm:$0xff] }
  0xc9   : > { %v511_v47 = vpop.permute.xlu1 %510  ;;  %v509_v56 = vpop.permute.xlu0 %508  ;;  %v712_v12 = vrot.slane %v2067_v20, 1 }
  0xca   : > { %v2056_v4 = vsel %vm773_vm3, %v768_v55, %v511_v47  ;;  %v2060_v42 = vsel %vm773_vm3, %v1958_v33, %v509_v56  ;;  %v650_v57 = vpop.permute.xlu2 %649 }
  0xcb   : > { %v713_v23 = vsel %vm458_vm1, %v1950_v22, %v712_v12 }
  0xcf   : > { %620 = vrot.lane.b32.xlu1 %v1844_v19, %s1587_s24  ;;  %589 = vrot.lane.b32.xlu0 %v1943_v14, %s1588_s25  ;;  %v557_v19 = vshrl.u32 %v1914_v45, 16  ;;  %v667_v14 = vshll.u32 %v2067_v20, 16 }
  0xd0   : > { %626 = vrot.lane.b32.xlu2 %v1968_v52, %s1587_s24 }
  0xd1   : > { %v522_v39 = vpop.permute.xlu1 %521  ;;  %v515_v37 = vpop.permute.xlu0 %514  ;;  %v2086_v52 = vor.u32 %v557_v19, %v1927_v24  ;;  %v760_v24 = vsel %vm744_vm2, %v1666_v25, %v1931_v5 }
  0xd2   : > { %v2073_v33 = vsel %vm802_vm5, %v1920_v2, %v522_v39  ;;  %v2077_v54 = vsel %vm773_vm3, %v1978_v3, %v515_v37  ;;  %v572_v40 = vpop.permute.xlu2 %571  ;;  %v2088_v2 = vrot.slane %v667_v14, 1  ;;  %v789_v15 = vsel %vm773_vm3, %v760_v24, %v503_v48 }
  0xd3   : > { %v818_v31 = vsel %vm802_vm5, %v789_v15, %v536_v36 }
  0xd4   : > { %v670_v26 = vsel %vm310_vm0, %v2086_v52, %v2088_v2 }
  0xd7   : > { %659 = vrot.lane.b32.xlu1 %v1914_v45, %s1589_s26  ;;  %653 = vrot.lane.b32.xlu0 %v1707_v51, %s1589_s26 }
  0xd8   : > { %697 = vrot.lane.b32.xlu2 %v1758_v30, %s1591_s28 }
  0xd9   : > { %v528_v61 = vpop.permute.xlu1 %527  ;;  %v526_v3 = vpop.permute.xlu0 %525 }
  0xda   : > { %v2094_v0 = vsel %vm802_vm5, %v1995_v35, %v526_v3  ;;  %v686_v29 = vpop.permute.xlu2 %685 }
  0xdf   : > { %734 = vrot.lane.b32.xlu1 %v1841_v18, %s1590_s27  ;;  %703 = vrot.lane.b32.xlu0 %v670_v26, %s1591_s28  ;;  %v231_v26 = vld [vmem:[%s1631_s20 + $0x78] sm:$0x1] }
  0xe0   : > { %740 = vrot.lane.b32.xlu2 %v713_v23, %s1590_s27 }
  0xe1   : > { %v617_v35 = vpop.permute.xlu1 %616  ;;  %v580_v38 = vpop.permute.xlu0 %579 }
  0xe2   : > { %v847_v5 = vsel %vm831_vm6, %v818_v31, %v580_v38  ;;  %v2114_v55 = vpop.permute.xlu2 %543 }
  0xe3   : > { %v876_v47 = vsel %vm860_vm7, %v847_v5, %v617_v35  ;;  %v235_v5 = vld [vmem:[%s1631_s20 + $0x80] sm:$0x1] }
  0xe4   : > { %v905_v36 = vsel %vm889_vm8, %v876_v47, %v650_v57 }
  0xe7   : > { %567 = vrot.lane.b32.xlu1 %v1670_v28, %s1588_s25  ;;  %531 = vrot.lane.b32.xlu0 %v1660_v16, %s1586_s23  ;;  %v810_v16 = vsel %vm802_vm5, %v1938_v13, %v528_v61  ;;  %v550_v13 = vunpack.c.l.b16 %v231_v26 }
  0xe8   : > { %575 = vrot.lane.b32.xlu2 %v1726_v63, %s1588_s25  ;;  %v839_v57 = vsel %vm831_vm6, %v810_v16, %v572_v40 }
  0xe9   : > { %v731_v48 = vpop.permute.xlu1 %730  ;;  %v694_v56 = vpop.permute.xlu0 %693  ;;  %v551_v61 = vpack.c.b16 %v550_v13, %v550_v13  ;;  %v826_v13 = vsel %vm802_vm5, %v2056_v4, %v2114_v55 }
  0xea   : > { %v934_v39 = vsel %vm918_vm9, %v905_v36, %v694_v56  ;;  %v619_v37 = vpop.permute.xlu2 %618 }
  0xeb   : > { %v963_v19 = vsel %vm947_vm10, %v934_v39, %v731_v48  ;;  %v561_v15 = vshll.u32 %v551_v61, 16  ;;  %v664_v48 = vunpack.c.l.b16 %v235_v5  ;;  %v600_v36 = vrot.slane %v551_v61, 1 }
  0xec   : > { %1409 = vmatmul.msk.bf16.vlgmr.msra.gmra.mxu2 %vm1012_vm11, %v963_v19 }
  0xed   : > { %v563_v31 = vrot.slane %v561_v15, 1 }
  0xef   : > { %612 = vrot.lane.b32.xlu1 %v1812_v60, %s1587_s24  ;;  %604 = vrot.lane.b32.xlu0 %v1789_v50, %s1587_s24  ;;  %v564_v47 = vsel %vm310_vm0, %v2086_v52, %v563_v31  ;;  %v601_v52 = vsel %vm458_vm1, %v1950_v22, %v600_v36 }
  0xf0   : > { %637 = vrot.lane.b32.xlu2 %v1637_v1, %s1589_s26 }
  0xf1   : > { %v642_v28 = vpop.permute.xlu1 %641  ;;  %v609_v63 = vpop.permute.xlu0 %608 }
  0xf2   : > { %v868_v14 = vsel %vm860_vm7, %v839_v57, %v609_v63  ;;  %v658_v3 = vpop.permute.xlu2 %657 }
  0xf3   : > { %v897_v24 = vsel %vm889_vm8, %v868_v14, %v642_v28 }
  0xf4   : > { %v926_v60 = vsel %vm918_vm9, %v897_v24, %v686_v29 }
  0xf7   : > { %681 = vrot.lane.b32.xlu1 %v1691_v41, %s1591_s28  ;;  %645 = vrot.lane.b32.xlu0 %v1666_v25, %s1589_s26 }
  0xf8   : > { %689 = vrot.lane.b32.xlu2 %v1723_v62, %s1591_s28 }
  0xf9   : > { %v538_v50 = vpop.permute.xlu1 %537  ;;  %v723_v1 = vpop.permute.xlu0 %722 }
  0xfa   : > { %v955_v40 = vsel %vm947_vm10, %v926_v60, %v723_v1  ;;  %v733_v23 = vpop.permute.xlu2 %732  ;;  %v820_v16 = vsel %vm802_vm5, %v2038_v27, %v538_v50 }
  0xfb   : > { %1405 = vmatmul.msk.bf16.vlgmr.msra.gmra.mxu1 %vm1012_vm11, %v955_v40 }
  0xff   : > { %726 = vrot.lane.b32.xlu1 %v1827_v10, %s1590_s27  ;;  %718 = vrot.lane.b32.xlu0 %v1795_v53, %s1590_s27 }
 0x100   : > { %541 = vrot.lane.b32.xlu2 %v1707_v51, %s1586_s23  ;;  %v665_v51 = vpack.c.b16 %v664_v48, %v664_v48 }
 0x101   : > { %v588_v35 = vpop.permute.xlu1 %587  ;;  %v582_v38 = vpop.permute.xlu0 %581 }
 0x102   : > { %v566_v29 = vpop.permute.xlu2 %565  ;;  %v849_v28 = vsel %vm831_vm6, %v820_v16, %v582_v38  ;;  %v675_v63 = vshll.u32 %v665_v51, 16  ;;  %v714_v4 = vrot.slane %v665_v51, 1 }
 0x104   : > { %v677_v24 = vrot.slane %v675_v63, 1 }
 0x107   : > { %585 = vrot.lane.b32.xlu1 %v1758_v30, %s1588_s25  ;;  %547 = vrot.lane.b32.xlu0 %v1914_v45, %s1586_s23  ;;  %v671_v30 = vshrl.u32 %v2067_v20, 16  ;;  %v878_v45 = vsel %vm860_vm7, %v849_v28, %v619_v37  ;;  %v855_v37 = vsel %vm831_vm6, %v826_v13, %v588_v35 }
 0x108   : > { %591 = vrot.lane.b32.xlu2 %v564_v47, %s1588_s25 }
 0x109   : > { %v652_v56 = vpop.permute.xlu1 %651  ;;  %v625_v39 = vpop.permute.xlu0 %624  ;;  %v673_v26 = vor.u32 %v671_v30, %v2088_v2 }
 0x10a   : > { %v611_v19 = vpop.permute.xlu2 %610  ;;  %v907_v57 = vsel %vm889_vm8, %v878_v45, %v652_v56  ;;  %v884_v1 = vsel %vm860_vm7, %v855_v37, %v625_v39 }
 0x10b   : > { %v913_v2 = vsel %vm889_vm8, %v884_v1, %v658_v3 }
 0x10f   : > { %628 = vrot.lane.b32.xlu1 %v601_v52, %s1587_s24  ;;  %622 = vrot.lane.b32.xlu0 %v1841_v18, %s1587_s24 }
 0x110   : > { %655 = vrot.lane.b32.xlu2 %v1719_v59, %s1589_s26  ;;  %v678_v59 = vsel %vm310_vm0, %v673_v26, %v677_v24 }
 0x111   : > { %v702_v14 = vpop.permute.xlu1 %701  ;;  %v696_v27 = vpop.permute.xlu0 %695 }
 0x112   : > { %v936_v22 = vsel %vm918_vm9, %v907_v57, %v696_v27  ;;  %v680_v50 = vpop.permute.xlu2 %679  ;;  %v942_v55 = vsel %vm918_vm9, %v913_v2, %v702_v14 }
 0x113   : > { %v965_v18 = vsel %vm947_vm10, %v936_v22, %v733_v23 }
 0x114   : > { %1410 = vmatmul.msk.bf16.gmra.mxu2 %vm1012_vm11, %v965_v18 }
 0x117   : > { %699 = vrot.lane.b32.xlu1 %v1772_v44, %s1591_s28  ;;  %661 = vrot.lane.b32.xlu0 %v2067_v20, %s1589_s26  ;;  %v715_v44 = vsel %vm458_vm1, %v712_v12, %v714_v4 }
 0x118   : > { %705 = vrot.lane.b32.xlu2 %v678_v59, %s1591_s28 }
 0x119   : > { %v530_v60 = vpop.permute.xlu1 %529  ;;  %v739_v40 = vpop.permute.xlu0 %738 }
 0x11a   : > { %v971_v61 = vsel %vm947_vm10, %v942_v55, %v739_v40  ;;  %v725_v23 = vpop.permute.xlu2 %724 }
 0x11b   : > { %1413 = vmatmul.msk.bf16.vlgmr.msra.gmra.mxu3 %vm1012_vm11, %v971_v61 }
 0x11f   : > { %742 = vrot.lane.b32.xlu1 %v715_v44, %s1590_s27  ;;  %736 = vrot.lane.b32.xlu0 %v1848_v21, %s1590_s27  ;;  %v833_v21 = vsel %vm831_vm6, %v2073_v33, %v566_v29 }
 0x120   : > { %533 = vrot.lane.b32.xlu2 %v1666_v25, %s1586_s23  ;;  %v812_v25 = vsel %vm802_vm5, %v2016_v6, %v530_v60 }
 0x121   : > { %v603_v3 = vpop.permute.xlu1 %602  ;;  %v574_v15 = vpop.permute.xlu0 %573 }
 0x122   : > { %v584_v35 = vpop.permute.xlu2 %583  ;;  %v862_v31 = vsel %vm860_vm7, %v833_v21, %v603_v3  ;;  %v841_v5 = vsel %vm831_vm6, %v812_v25, %v574_v15 }
 0x127   : > { %577 = vrot.lane.b32.xlu1 %v1723_v62, %s1588_s25  ;;  %569 = vrot.lane.b32.xlu0 %v1691_v41, %s1588_s25  ;;  %v870_v41 = vsel %vm860_vm7, %v841_v5, %v611_v19 }
 0x128   : > { %606 = vrot.lane.b32.xlu2 %v1795_v53, %s1587_s24 }
 0x129   : > { %v644_v20 = vpop.permute.xlu1 %643  ;;  %v636_v38 = vpop.permute.xlu0 %635 }
 0x12a   : > { %v627_v12 = vpop.permute.xlu2 %626  ;;  %v891_v62 = vsel %vm889_vm8, %v862_v31, %v636_v38  ;;  %v899_v53 = vsel %vm889_vm8, %v870_v41, %v644_v20  ;;  %v2277_v31 = vld [vmem:[%s2391_s3] ss:$0 sm:$0xff] }
 0x12b   : > { %v920_v6 = vsel %vm918_vm9, %v891_v62, %v680_v50 }
 0x12f   : > { %639 = vrot.lane.b32.xlu1 %v1650_v8, %s1589_s26  ;;  %614 = vrot.lane.b32.xlu0 %v1827_v10, %s1587_s24 }
 0x130   : > { %647 = vrot.lane.b32.xlu2 %v1675_v32, %s1589_s26 }
 0x131   : > { %v717_v33 = vpop.permute.xlu1 %716  ;;  %v688_v29 = vpop.permute.xlu0 %687 }
 0x132   : > { %v928_v47 = vsel %vm918_vm9, %v899_v53, %v688_v29  ;;  %v949_v48 = vsel %vm947_vm10, %v920_v6, %v717_v33  ;;  %v698_v36 = vpop.permute.xlu2 %697 }
 0x133   : > { %1402 = vmatmul.msk.bf16.vlgmr.msra.gmra.mxu0 %vm1012_vm11, %v949_v48  ;;  %v957_v8 = vsel %vm947_vm10, %v928_v47, %v725_v23 }
 0x134   : > { %1406 = vmatmul.msk.bf16.gmra.mxu1 %vm1012_vm11, %v957_v8 }
 0x137   : > { %691 = vrot.lane.b32.xlu1 %v1733_v7, %s1591_s28  ;;  %683 = vrot.lane.b32.xlu0 %v1681_v34, %s1591_s28 }
 0x138   : > { %720 = vrot.lane.b32.xlu2 %v1809_v58, %s1590_s27 }
 0x139   : > { %v546_v10 = vpop.permute.xlu1 %545  ;;  %v540_v56 = vpop.permute.xlu0 %539 }
 0x13a   : > { %v741_v32 = vpop.permute.xlu2 %740  ;;  %v822_v16 = vsel %vm802_vm5, %v1983_v11, %v540_v56  ;;  %v828_v34 = vsel %vm802_vm5, %v1999_v46, %v546_v10 }
 0x13b   : > { %v851_v28 = vsel %vm831_vm6, %v822_v16, %v584_v35 }
 0x13f   : > { %728 = vrot.lane.b32.xlu0 %v1824_v9, %s1590_s27 }
 0x141   : > { %v621_v39 = vpop.permute.xlu1 %620  ;;  %v590_v51 = vpop.permute.xlu0 %589 }
 0x142   : > { %v576_v19 = vpop.permute.xlu2 %575  ;;  %v880_v30 = vsel %vm860_vm7, %v851_v28, %v621_v39  ;;  %v857_v58 = vsel %vm831_vm6, %v828_v34, %v590_v51 }
 0x143   : > { %v886_v9 = vsel %vm860_vm7, %v857_v58, %v627_v12 }
 0x149   : > { %v660_v52 = vpop.permute.xlu1 %659  ;;  %v654_v7 = vpop.permute.xlu0 %653 }
 0x14a   : > { %v909_v63 = vsel %vm889_vm8, %v880_v30, %v654_v7  ;;  %v638_v45 = vpop.permute.xlu2 %637  ;;  %v915_v57 = vsel %vm889_vm8, %v886_v9, %v660_v52 }
 0x14b   : > { %v938_v27 = vsel %vm918_vm9, %v909_v63, %v698_v36 }
 0x151   : > { %v735_v14 = vpop.permute.xlu1 %734  ;;  %v704_v11 = vpop.permute.xlu0 %703 }
 0x152   : > { %v944_v22 = vsel %vm918_vm9, %v915_v57, %v704_v11  ;;  %v967_v46 = vsel %vm947_vm10, %v938_v27, %v735_v14  ;;  %v690_v50 = vpop.permute.xlu2 %689 }
 0x153   : > { %1411 = vmatmul.msk.bf16.gmra.mxu2 %vm1012_vm11, %v967_v46  ;;  %v973_v26 = vsel %vm947_vm10, %v944_v22, %v741_v32 }
 0x154   : > { %1414 = vmatmul.msk.bf16.gmra.mxu3 %vm1012_vm11, %v973_v26 }
 0x159   : > { %v568_v24 = vpop.permute.xlu1 %567  ;;  %v532_v13 = vpop.permute.xlu0 %531 }
 0x15a   : > { %v542_v1 = vpop.permute.xlu2 %541  ;;  %v814_v59 = vsel %vm802_vm5, %v2012_v17, %v532_v13  ;;  %v835_v55 = vsel %vm831_vm6, %v2022_v43, %v568_v24  ;;  %v2265_v17 = vld [vmem:[%s2390_s2] ss:$0 sm:$0xff] }
 0x15b   : > { %v843_v60 = vsel %vm831_vm6, %v814_v59, %v576_v19  ;;  %v824_v9 = vsel %vm802_vm5, %v2060_v42, %v542_v1 }
 0x161   : > { %v613_v18 = vpop.permute.xlu1 %612  ;;  %v605_v37 = vpop.permute.xlu0 %604 }
 0x162   : > { %v872_v40 = vsel %vm860_vm7, %v843_v60, %v613_v18  ;;  %v864_v61 = vsel %vm860_vm7, %v835_v55, %v605_v37  ;;  %v592_v23 = vpop.permute.xlu2 %591 }
 0x163   : > { %v893_v15 = vsel %vm889_vm8, %v864_v61, %v638_v45 }
 0x169   : > { %v682_v2 = vpop.permute.xlu1 %681  ;;  %v646_v4 = vpop.permute.xlu0 %645 }
 0x16a   : > { %v901_v44 = vsel %vm889_vm8, %v872_v40, %v646_v4  ;;  %v922_v43 = vsel %vm918_vm9, %v893_v15, %v682_v2  ;;  %v656_v62 = vpop.permute.xlu2 %655 }
 0x16b   : > { %v930_v38 = vsel %vm918_vm9, %v901_v44, %v690_v50 }
 0x16f   : > { %v1089_v3 = vpop.f32.mrf.mxu2 }
 0x170   : > { %v1142_v25 = vmul.f32 %v2265_v17, %v1089_v3 }
 0x171   : > { %v727_v35 = vpop.permute.xlu1 %726  ;;  %v719_v20 = vpop.permute.xlu0 %718 }
 0x172   : > { %v951_v12 = vsel %vm947_vm10, %v922_v43, %v719_v20  ;;  %v959_v21 = vsel %vm947_vm10, %v930_v38, %v727_v35  ;;  %v1174_v41 = vadd.f32 %v2277_v31, %v1142_v25  ;;  %v706_v16 = vpop.permute.xlu2 %705 }
 0x173   : > { %1403 = vmatmul.msk.bf16.gmra.mxu0 %vm1012_vm11, %v951_v12  ;;  %1407 = vmatmul.msk.bf16.gmra.mxu1 %vm1012_vm11, %v959_v21 }
 0x174   : > { %v1202_v48 = vmax.f32 %v1174_v41, 0.0 }
 0x177   : > { %v1091_v5 = vpop.f32.mrf.mxu2 }
 0x178   : > { %v1143_v53 = vmul.f32 %v2265_v17, %v1091_v5  ;;  %v1069_v33 = vpop.f32.mrf.mxu1 }
 0x179   : > { %v586_v29 = vpop.permute.xlu1 %585  ;;  %v548_v6 = vpop.permute.xlu0 %547  ;;  %v1134_v8 = vmul.f32 %v2265_v17, %v1069_v33 }
 0x17a   : > { %v1175_v47 = vadd.f32 %v2277_v31, %v1143_v53  ;;  %v830_v30 = vsel %vm802_vm5, %v2077_v54, %v548_v6  ;;  %v853_v45 = vsel %vm831_vm6, %v824_v9, %v586_v29  ;;  %v534_v57 = vpop.permute.xlu2 %533 }
 0x17b   : > { %v1166_v32 = vadd.f32 %v2277_v31, %v1134_v8  ;;  %v859_v14 = vsel %vm831_vm6, %v830_v30, %v592_v23 }
 0x17c   : > { %v1203_v36 = vmax.f32 %v1175_v47, 0.0 }
 0x17d   : > { %v1194_v7 = vmax.f32 %v1166_v32, 0.0 }
 0x17e   : > { %v1485_v10 = vpack.c.bf16 %v1203_v36, %v1202_v48 }
 0x180   : > { %1534 = vst [vmem:[%s2286_s22 + $0x38] sm:$0xff] %v1485_v10   ;;  %v1071_v56 = vpop.f32.mrf.mxu1 }
 0x181   : > { %v1135_v39 = vmul.f32 %v2265_v17, %v1071_v56  ;;  %v629_v51 = vpop.permute.xlu1 %628  ;;  %v623_v19 = vpop.permute.xlu0 %622 }
 0x182   : > { %v888_v11 = vsel %vm860_vm7, %v859_v14, %v629_v51  ;;  %v882_v27 = vsel %vm860_vm7, %v853_v45, %v623_v19  ;;  %v607_v18 = vpop.permute.xlu2 %606 }
 0x183   : > { %v1167_v52 = vadd.f32 %v2277_v31, %v1135_v39  ;;  %v911_v46 = vsel %vm889_vm8, %v882_v27, %v656_v62 }
 0x185   : > { %v1195_v34 = vmax.f32 %v1167_v52, 0.0 }
 0x187   : > { %v1465_v28 = vpack.c.bf16 %v1195_v34, %v1194_v7 }
 0x189   : > { %1530 = vst [vmem:[%s2286_s22 + $0x18] sm:$0xff] %v1465_v28   ;;  %v700_v58 = vpop.permute.xlu1 %699  ;;  %v662_v63 = vpop.permute.xlu0 %661 }
 0x18a   : > { %v917_v22 = vsel %vm889_vm8, %v888_v11, %v662_v63  ;;  %v940_v54 = vsel %vm918_vm9, %v911_v46, %v700_v58  ;;  %v648_v55 = vpop.permute.xlu2 %647 }
 0x18b   : > { %v946_v13 = vsel %vm918_vm9, %v917_v22, %v706_v16 }
 0x191   : > { %v743_v26 = vpop.permute.xlu1 %742  ;;  %v737_v24 = vpop.permute.xlu0 %736 }
 0x192   : > { %v969_v42 = vsel %vm947_vm10, %v940_v54, %v737_v24  ;;  %v975_v50 = vsel %vm947_vm10, %v946_v13, %v743_v26  ;;  %v721_v62 = vpop.permute.xlu2 %720 }
 0x193   : > { %1412 = vmatmul.msk.bf16.gmra.mxu2 %vm1012_vm11, %v969_v42  ;;  %1415 = vmatmul.msk.bf16.gmra.mxu3 %vm1012_vm11, %v975_v50 }
 0x197   : > { %v1094_v37 = vpop.f32.mrf.mxu2 }
 0x198   : > { %v1144_v2 = vmul.f32 %v2265_v17, %v1094_v37 }
 0x199   : > { %v570_v1 = vpop.permute.xlu0 %569  ;;  %v578_v59 = vpop.permute.xlu1 %577 }
 0x19a   : > { %v1176_v40 = vadd.f32 %v2277_v31, %v1144_v2  ;;  %v837_v20 = vsel %vm831_vm6, %v2094_v0, %v570_v1  ;;  %v816_v0 = vsel %vm802_vm5, %v1963_v49, %v534_v57 }
 0x19b   : > { %v866_v5 = vsel %vm860_vm7, %v837_v20, %v607_v18  ;;  %v845_v36 = vsel %vm831_vm6, %v816_v0, %v578_v59 }
 0x19c   : > { %v1204_v15 = vmax.f32 %v1176_v40, 0.0 }
 0x19e   : > { %v1109_v4 = vpop.f32.mrf.mxu3 }
 0x19f   : > { %v1096_v60 = vpop.f32.mrf.mxu2  ;;  %v1150_v3 = vmul.f32 %v2265_v17, %v1109_v4 }
 0x1a0   : > { %v1145_v61 = vmul.f32 %v2265_v17, %v1096_v60 }
 0x1a1   : > { %v615_v23 = vpop.permute.xlu0 %614  ;;  %v640_v35 = vpop.permute.xlu1 %639  ;;  %v1182_v21 = vadd.f32 %v2277_v31, %v1150_v3 }
 0x1a2   : > { %v1177_v44 = vadd.f32 %v2277_v31, %v1145_v61  ;;  %v895_v41 = vsel %vm889_vm8, %v866_v5, %v640_v35  ;;  %v874_v8 = vsel %vm860_vm7, %v845_v36, %v615_v23 }
 0x1a3   : > { %v1210_v6 = vmax.f32 %v1182_v21, 0.0  ;;  %v903_v32 = vsel %vm889_vm8, %v874_v8, %v648_v55 }
 0x1a4   : > { %v1205_v43 = vmax.f32 %v1177_v44, 0.0 }
 0x1a6   : > { %v1490_v38 = vpack.c.bf16 %v1205_v43, %v1204_v15  ;;  %v1111_v12 = vpop.f32.mrf.mxu3 }
 0x1a7   : > { %v1151_v25 = vmul.f32 %v2265_v17, %v1111_v12 }
 0x1a8   : > { %1535 = vst [vmem:[%s2286_s22 + $0x40] sm:$0xff] %v1490_v38  }
 0x1a9   : > { %v1183_v53 = vadd.f32 %v2277_v31, %v1151_v25  ;;  %v684_v33 = vpop.permute.xlu0 %683  ;;  %v692_v56 = vpop.permute.xlu1 %691 }
 0x1aa   : > { %v924_v29 = vsel %vm918_vm9, %v895_v41, %v684_v33  ;;  %v932_v51 = vsel %vm918_vm9, %v903_v32, %v692_v56 }
 0x1ab   : > { %v1211_v47 = vmax.f32 %v1183_v53, 0.0  ;;  %v953_v48 = vsel %vm947_vm10, %v924_v29, %v721_v62 }
 0x1ac   : > { %1404 = vmatmul.msk.bf16.gmra.mxu0 %vm1012_vm11, %v953_v48 }
 0x1ad   : > { %v1505_v10 = vpack.c.bf16 %v1211_v47, %v1210_v6 }
 0x1af   : > { %1538 = vst [vmem:[%s2286_s22 + $0x58] sm:$0xff] %v1505_v10  }
 0x1b0   : > { %v1054_v39 = vpop.f32.mrf.mxu0 }
 0x1b1   : > { %v1074_v19 = vpop.f32.mrf.mxu1  ;;  %v729_v49 = vpop.permute.xlu0 %728  ;;  %v1128_v52 = vmul.f32 %v2265_v17, %v1054_v39 }
 0x1b2   : > { %v961_v16 = vsel %vm947_vm10, %v932_v51, %v729_v49  ;;  %v1136_v7 = vmul.f32 %v2265_v17, %v1074_v19 }
 0x1b3   : > { %1408 = vmatmul.msk.bf16.gmra.mxu1 %vm1012_vm11, %v961_v16  ;;  %v1160_v28 = vadd.f32 %v2277_v31, %v1128_v52 }
 0x1b4   : > { %v1168_v63 = vadd.f32 %v2277_v31, %v1136_v7 }
 0x1b5   : > { %v1188_v14 = vmax.f32 %v1160_v28, 0.0 }
 0x1b6   : > { %v1196_v27 = vmax.f32 %v1168_v63, 0.0 }
 0x1b8   : > { %v1056_v34 = vpop.f32.mrf.mxu0 }
 0x1b9   : > { %v1129_v30 = vmul.f32 %v2265_v17, %v1056_v34  ;;  %v1076_v58 = vpop.f32.mrf.mxu1 }
 0x1ba   : > { %v1137_v9 = vmul.f32 %v2265_v17, %v1076_v58 }
 0x1bb   : > { %v1161_v45 = vadd.f32 %v2277_v31, %v1129_v30 }
 0x1bc   : > { %v1169_v57 = vadd.f32 %v2277_v31, %v1137_v9 }
 0x1bd   : > { %v1189_v11 = vmax.f32 %v1161_v45, 0.0 }
 0x1be   : > { %v1197_v22 = vmax.f32 %v1169_v57, 0.0 }
 0x1bf   : > { %v1450_v46 = vpack.c.bf16 %v1189_v11, %v1188_v14 }
 0x1c0   : > { %v1470_v54 = vpack.c.bf16 %v1197_v22, %v1196_v27 }
 0x1c1   : > { %1451 = vst [vmem:[%s2286_s22] sm:$0xff] %v1450_v46  }
 0x1c2   : > { %1531 = vst [vmem:[%s2286_s22 + $0x20] sm:$0xff] %v1470_v54  }
 0x1d6   : > { %v1099_v26 = vpop.f32.mrf.mxu2 }
 0x1d7   : > { %v1114_v24 = vpop.f32.mrf.mxu3  ;;  %v1146_v13 = vmul.f32 %v2265_v17, %v1099_v26 }
 0x1d8   : > { %v1152_v42 = vmul.f32 %v2265_v17, %v1114_v24 }
 0x1d9   : > { %v1178_v18 = vadd.f32 %v2277_v31, %v1146_v13 }
 0x1da   : > { %v1184_v59 = vadd.f32 %v2277_v31, %v1152_v42 }
 0x1db   : > { %v1206_v60 = vmax.f32 %v1178_v18, 0.0 }
 0x1dc   : > { %v1212_v61 = vmax.f32 %v1184_v59, 0.0 }
 0x1de   : > { %v1101_v50 = vpop.f32.mrf.mxu2 }
 0x1df   : > { %v1147_v37 = vmul.f32 %v2265_v17, %v1101_v50  ;;  %v1116_v1 = vpop.f32.mrf.mxu3 }
 0x1e0   : > { %v1153_v2 = vmul.f32 %v2265_v17, %v1116_v1 }
 0x1e1   : > { %v1179_v4 = vadd.f32 %v2277_v31, %v1147_v37 }
 0x1e2   : > { %v1185_v55 = vadd.f32 %v2277_v31, %v1153_v2 }
 0x1e3   : > { %v1207_v40 = vmax.f32 %v1179_v4, 0.0 }
 0x1e4   : > { %v1213_v23 = vmax.f32 %v1185_v55, 0.0 }
 0x1e5   : > { %v1495_v44 = vpack.c.bf16 %v1207_v40, %v1206_v60 }
 0x1e6   : > { %v1510_v3 = vpack.c.bf16 %v1213_v23, %v1212_v61 }
 0x1e7   : > { %1536 = vst [vmem:[%s2286_s22 + $0x48] sm:$0xff] %v1495_v44  }
 0x1e8   : > { %1539 = vst [vmem:[%s2286_s22 + $0x60] sm:$0xff] %v1510_v3  }
 0x1f0   : > { %v1059_v15 = vpop.f32.mrf.mxu0  ;;  %v1079_v43 = vpop.f32.mrf.mxu1 }
 0x1f1   : > { %v1130_v35 = vmul.f32 %v2265_v17, %v1059_v15  ;;  %v1138_v20 = vmul.f32 %v2265_v17, %v1079_v43 }
 0x1f3   : > { %v1162_v21 = vadd.f32 %v2277_v31, %v1130_v35  ;;  %v1170_v25 = vadd.f32 %v2277_v31, %v1138_v20 }
 0x1f5   : > { %v1190_v33 = vmax.f32 %v1162_v21, 0.0  ;;  %v1198_v29 = vmax.f32 %v1170_v25, 0.0 }
 0x1f8   : > { %v1061_v38 = vpop.f32.mrf.mxu0  ;;  %v1081_v12 = vpop.f32.mrf.mxu1 }
 0x1f9   : > { %v1131_v5 = vmul.f32 %v2265_v17, %v1061_v38  ;;  %v1139_v62 = vmul.f32 %v2265_v17, %v1081_v12 }
 0x1fb   : > { %v1163_v41 = vadd.f32 %v2277_v31, %v1131_v5  ;;  %v1171_v53 = vadd.f32 %v2277_v31, %v1139_v62 }
 0x1fd   : > { %v1191_v0 = vmax.f32 %v1163_v41, 0.0  ;;  %v1199_v6 = vmax.f32 %v1171_v53, 0.0 }
 0x1ff   : > { %v1455_v47 = vpack.c.bf16 %v1191_v0, %v1190_v33  ;;  %v1475_v48 = vpack.c.bf16 %v1199_v6, %v1198_v29 }
 0x201   : > { %1528 = vst [vmem:[%s2286_s22 + $0x8] sm:$0xff] %v1455_v47  }
 0x202   : > { %1532 = vst [vmem:[%s2286_s22 + $0x28] sm:$0xff] %v1475_v48  }
 0x216   : > { %v1104_v36 = vpop.f32.mrf.mxu2  ;;  %v1119_v8 = vpop.f32.mrf.mxu3 }
 0x217   : > { %v1148_v10 = vmul.f32 %v2265_v17, %v1104_v36  ;;  %v1154_v56 = vmul.f32 %v2265_v17, %v1119_v8 }
 0x219   : > { %v1180_v51 = vadd.f32 %v2277_v31, %v1148_v10  ;;  %v1186_v19 = vadd.f32 %v2277_v31, %v1154_v56 }
 0x21b   : > { %v1208_v34 = vmax.f32 %v1180_v51, 0.0  ;;  %v1214_v28 = vmax.f32 %v1186_v19, 0.0 }
 0x21e   : > { %v1106_v32 = vpop.f32.mrf.mxu2  ;;  %v1121_v39 = vpop.f32.mrf.mxu3 }
 0x21f   : > { %v1149_v49 = vmul.f32 %v2265_v17, %v1106_v32  ;;  %v1155_v16 = vmul.f32 %v2265_v17, %v1121_v39 }
 0x221   : > { %v1181_v52 = vadd.f32 %v2277_v31, %v1149_v49  ;;  %v1187_v7 = vadd.f32 %v2277_v31, %v1155_v16 }
 0x223   : > { %v1209_v30 = vmax.f32 %v1181_v52, 0.0  ;;  %v1215_v58 = vmax.f32 %v1187_v7, 0.0 }
 0x225   : > { %v1500_v63 = vpack.c.bf16 %v1209_v30, %v1208_v34  ;;  %v1515_v9 = vpack.c.bf16 %v1215_v58, %v1214_v28 }
 0x227   : > { %1537 = vst [vmem:[%s2286_s22 + $0x50] sm:$0xff] %v1500_v63  }
 0x228   : > { %1540 = vst [vmem:[%s2286_s22 + $0x68] sm:$0xff] %v1515_v9  }
 0x229   : > { %v1064_v45 = vpop.f32.mrf.mxu0 }
 0x22a   : > { %v1132_v57 = vmul.f32 %v2265_v17, %v1064_v45 }
 0x22c   : > { %v1164_v27 = vadd.f32 %v2277_v31, %v1132_v57 }
 0x22e   : > { %v1192_v26 = vmax.f32 %v1164_v27, 0.0 }
 0x230   : > { %v1084_v14 = vpop.f32.mrf.mxu1 }
 0x231   : > { %v1066_v11 = vpop.f32.mrf.mxu0  ;;  %v1140_v54 = vmul.f32 %v2265_v17, %v1084_v14 }
 0x232   : > { %v1133_v22 = vmul.f32 %v2265_v17, %v1066_v11 }
 0x233   : > { %v1172_v50 = vadd.f32 %v2277_v31, %v1140_v54 }
 0x234   : > { %v1165_v46 = vadd.f32 %v2277_v31, %v1133_v22 }
 0x235   : > { %v1200_v1 = vmax.f32 %v1172_v50, 0.0 }
 0x236   : > { %v1193_v24 = vmax.f32 %v1165_v46, 0.0 }
 0x238   : > { %v1460_v13 = vpack.c.bf16 %v1193_v24, %v1192_v26  ;;  %v1086_v42 = vpop.f32.mrf.mxu1 }
 0x239   : > { %v1141_v18 = vmul.f32 %v2265_v17, %v1086_v42 }
 0x23a   : > { %1529 = vst [vmem:[%s2286_s22 + $0x10] sm:$0xff] %v1460_v13  }
 0x23b   : > { %v1173_v37 = vadd.f32 %v2277_v31, %v1141_v18 }
 0x23d   : > { %v1201_v59 = vmax.f32 %v1173_v37, 0.0 }
 0x23f   : > { %v1480_v2 = vpack.c.bf16 %v1201_v59, %v1200_v1 }
 0x241   : > { %1533 = vst [vmem:[%s2286_s22 + $0x30] sm:$0xff] %v1480_v2  }
 0x242 PF: > { %s14_s15 = sadd.s32 1, %s1582_s15  }
 0x243   : > { %p11_p4 = scmp.ge.s32.totalorder %s14_s15, 4  }
 0x245   :  { %13 = sbr.rel (!%p11_p4) target bundleno = 1 (0x1), region = 66 }

// kernel: conv_layer_forward.2
= control target key start
LH: loop header
LB: loop body
LE: loop exit
PB: predicated region body
PF: predicated region fallthrough
CT: control target
= control target key end

     0   :  { %s1701_s12 = smov 0   ;;  %s2728_s0 = inlined_call_operand.vmem [shape: bf16[2,264,8], index: 0, kind: input, shape index: {}]   ;;  %s2729_s1 = inlined_call_operand.vmem [shape: bf16[72,128], index: 1, kind: input, shape index: {}]   ;;  %s2730_s2 = inlined_call_operand.vmem [shape: f32[224,1], index: 2, kind: input, shape index: {}]   ;;  %s2731_s3 = inlined_call_operand.vmem [shape: f32[2,2,128], index: 3, kind: output, shape index: {}]  }
   0x1 LB: > { %s1497_s13 = sadd.s32 4294967295, %s1670_s12   ;;  %p1501_p0 = scmp.ge.s32.totalorder %s1670_s12, 1  ;;  %s1670_s12 = sphi %s1701_s12, %s13_s12  }
   0x2   : > { %p137_p1 = scmp.lt.s32.totalorder %s1670_s12, 3 }
   0x4   : > { %p138_p2 = pnand %p1501_p0, %p137_p1 }
   0x6   : > { %141 = sbr.rel (%p138_p2) target bundleno = 668 (0x29c), region = 32 }
   0xb   : > { %p160_p3 = scmp.lt.s32.totalorder %s1497_s13, 1  ;;  %vm281_vm0 = vsmask.f32 7424  ;;  %s1672_s18 = smov 8   ;;  %vm429_vm1 = vcmask 1046528   ;;  %vm715_vm2 = vcmask 64512  }
   0xc   : > { %s1673_s19 = smov 16   ;;  %s1674_s20 = smov 24   ;;  %vm744_vm3 = vcmask 130048   ;;  %vm773_vm4 = vcmask 195584   ;;  %vm802_vm5 = vcmask 261120   ;;  %vm1012_vm6 = vcmask 1043456  }
   0xd   : > { %s2757_s13 = smov (!%p160_p3, %s1497_s13), 1  ;;  %s1675_s21 = smov 32   ;;  %vm831_vm7 = vcmask 326656   ;;  %vm860_vm8 = vcmask 392192   ;;  %vm889_vm9 = vcmask 457728   ;;  %vm918_vm10 = vcmask 523264  }
   0xe   : > { %s1643_s14 = smul.u32 132, %s2757_s13  ;;  %s1676_s22 = smov 40   ;;  %vm983_vm11 = vcmask 588800  }
   0xf   : > { %s1677_s23 = smov 48   ;;  %s1678_s24 = smov 56  }
  0x10   : > { %s1715_s17 = scalar_lea.vmem %s2728_s0, %s1643_s14  ;;  %s1679_s25 = smov 64  }
  0x11   : > { %v1718_v0 = vld [vmem:[%s1715_s17 + $0x10] sm:$0xff]   ;;  %v1721_v1 = vld [vmem:[%s1715_s17 + $0x18] sm:$0xff]  ;;  %v1724_v2 = vld [vmem:[%s1715_s17] sm:$0xff]  }
  0x12   : > { %v298_v3 = vshll.u32 %v1718_v0, 16  ;;  %v302_v4 = vshrl.u32 %v1718_v0, 16  ;;  %v1729_v5 = vld [vmem:[%s1715_s17 + $0x8] sm:$0xff]   ;;  %v283_v6 = vshrl.u32 %v1724_v2, 16  ;;  %v285_v7 = vshll.u32 %v1724_v2, 16  ;;  %v1734_v8 = vld [vmem:[%s1715_s17 + $0x20] sm:$0xff] }
  0x13   : > { %v306_v9 = vshll.u32 %v1721_v1, 16  ;;  %v290_v10 = vshll.u32 %v1729_v5, 16  ;;  %v1739_v11 = vld [vmem:[%s1715_s17 + $0x28] sm:$0xff]  ;;  %v314_v14 = vshll.u32 %v1734_v8, 16  ;;  %v318_v15 = vshrl.u32 %v1734_v8, 16  ;;  %v1744_v16 = vld [vmem:[%s1715_s17 + $0x30] sm:$0xff] }
  0x14   : > { %v300_v12 = vrot.slane %v298_v3, 1  ;;  %v287_v13 = vrot.slane %v285_v7, 1  ;;  %v322_v19 = vshll.u32 %v1739_v11, 16  ;;  %v310_v20 = vshrl.u32 %v1721_v1, 16  ;;  %v1750_v25 = vld [vmem:[%s1715_s17 + $0x38] sm:$0xff]  ;;  %v1759_v32 = vld [vmem:[%s1715_s17 + $0x40] sm:$0xff] }
  0x15   : > { %v308_v17 = vrot.slane %v306_v9, 1  ;;  %v292_v18 = vrot.slane %v290_v10, 1  ;;  %v316_v23 = vrot.slane %v314_v14, 1  ;;  %v294_v24 = vshrl.u32 %v1729_v5, 16  ;;  %v1772_v40 = vld [vmem:[%s1715_s17 + $0x48] sm:$0xff]  ;;  %v1778_v42 = vld [vmem:[%s1715_s17 + $0x50] sm:$0xff] }
  0x16   : > { %v304_v21 = vor.u32 %v302_v4, %v300_v12  ;;  %v288_v22 = vor.u32 %v287_v13, %v283_v6  ;;  %v324_v26 = vrot.slane %v322_v19, 1  ;;  %v326_v27 = vshrl.u32 %v1739_v11, 16  ;;  %v1791_v51 = vld [vmem:[%s1715_s17 + $0x58] sm:$0xff]  ;;  %v198_v55 = vld [vmem:[%s1715_s17 + $0x70] sm:$0x1]  ;;  %v1803_v59 = vld [vmem:[%s1715_s17 + $0x60] sm:$0xff] }
  0x17   : > { %v320_v30 = vor.u32 %v318_v15, %v316_v23  ;;  %v330_v31 = vshll.u32 %v1744_v16, 16  ;;  %v312_v33 = vor.u32 %v310_v20, %v308_v17  ;;  %v296_v35 = vor.u32 %v294_v24, %v292_v18  ;;  %v1814_v4 = vld [vmem:[%s1715_s17 + $0x68] sm:$0xff] }
  0x18   : > { %v1754_v28 = vsel %vm281_vm0, %v304_v21, %v308_v17  ;;  %v293_v29 = vsel %vm281_vm0, %v288_v22, %v292_v18  ;;  %v338_v36 = vshll.u32 %v1750_v25, 16  ;;  %v328_v37 = vor.u32 %v326_v27, %v324_v26  ;;  %v1619_v22 = vld [vmem:[%s1715_s17] sm:$0xf0] }
  0x19   : > { %402 = vrot.lane.b32.xlu1 %v1754_v28, %s1672_s18  ;;  %398 = vrot.lane.b32.xlu0 %v293_v29, %s1672_s18  ;;  %v1765_v34 = vsel %vm281_vm0, %v320_v30, %v324_v26  ;;  %v332_v38 = vrot.slane %v330_v31, 1  ;;  %v346_v39 = vshll.u32 %v1759_v32, 16  ;;  %v1775_v41 = vsel %vm281_vm0, %v312_v33, %v316_v23  ;;  %v1620_v23 = vld [vmem:[%s1715_s17] sm:$0xe] }
  0x1a   : > { %406 = vrot.lane.b32.xlu2 %v1765_v34, %s1672_s18  ;;  %v1781_v43 = vsel %vm281_vm0, %v296_v35, %v300_v12  ;;  %v340_v44 = vrot.slane %v338_v36, 1  ;;  %v342_v45 = vshrl.u32 %v1750_v25, 16  ;;  %v334_v46 = vshrl.u32 %v1744_v16, 16 }
  0x1b   : > { %v1786_v47 = vsel %vm281_vm0, %v328_v37, %v332_v38  ;;  %v348_v48 = vrot.slane %v346_v39, 1  ;;  %v350_v49 = vshrl.u32 %v1759_v32, 16  ;;  %v354_v50 = vshll.u32 %v1772_v40, 16 }
  0x1c   : > { %v362_v52 = vshll.u32 %v1778_v42, 16  ;;  %v344_v53 = vor.u32 %v342_v45, %v340_v44  ;;  %v336_v54 = vor.u32 %v334_v46, %v332_v38  ;;  %v370_v58 = vshll.u32 %v1791_v51, 16 }
  0x1d   : > { %v352_v56 = vor.u32 %v350_v49, %v348_v48  ;;  %v356_v57 = vrot.slane %v354_v50, 1  ;;  %v366_v61 = vshrl.u32 %v1778_v42, 16  ;;  %v358_v3 = vshrl.u32 %v1772_v40, 16 }
  0x1e   : > { %v364_v60 = vrot.slane %v362_v52, 1  ;;  %v1807_v62 = vsel %vm281_vm0, %v344_v53, %v348_v48  ;;  %v1810_v63 = vsel %vm281_vm0, %v336_v54, %v340_v44  ;;  %v279_v6 = vunpack.c.l.b16 %v198_v55 }
  0x1f   : > { %v1817_v7 = vsel %vm281_vm0, %v352_v56, %v356_v57  ;;  %v372_v9 = vrot.slane %v370_v58, 1  ;;  %v374_v10 = vshrl.u32 %v1791_v51, 16  ;;  %v378_v12 = vshll.u32 %v1803_v59, 16 }
  0x20   : > { %v368_v13 = vor.u32 %v366_v61, %v364_v60  ;;  %v360_v14 = vor.u32 %v358_v3, %v356_v57  ;;  %v1825_v15 = vpack.c.b16 %v279_v6, %v279_v6  ;;  %v386_v17 = vshll.u32 %v1814_v4, 16 }
  0x21   : > { %404 = vrot.lane.b32.xlu1 %v1775_v41, %s1672_s18  ;;  %400 = vrot.lane.b32.xlu0 %v1781_v43, %s1672_s18  ;;  %v376_v18 = vor.u32 %v374_v10, %v372_v9  ;;  %v380_v19 = vrot.slane %v378_v12, 1  ;;  %v390_v21 = vshrl.u32 %v1814_v4, 16  ;;  %v382_v29 = vshrl.u32 %v1803_v59, 16 }
  0x22   : > { %408 = vrot.lane.b32.xlu2 %v1786_v47, %s1672_s18  ;;  %v1831_v20 = vsel %vm281_vm0, %v368_v13, %v372_v9  ;;  %v1837_v24 = vsel %vm281_vm0, %v360_v14, %v364_v60  ;;  %v388_v26 = vrot.slane %v386_v17, 1  ;;  %v394_v27 = vshll.u32 %v1825_v15, 16 }
  0x23   : > { %v1842_v30 = vsel %vm281_vm0, %v376_v18, %v380_v19  ;;  %v1621_v31 = vor.u32 %v1620_v23, %v1619_v22  ;;  %v384_v36 = vor.u32 %v382_v29, %v380_v19  ;;  %v431_v38 = vrot.slane %v1729_v5, 1  ;;  %v1965_v29 = vld [vmem:[%s1715_s17 + $0x70] sm:$0xff] }
  0x24   : > { %v1848_v33 = vor.u32 %v390_v21, %v388_v26  ;;  %v396_v35 = vrot.slane %v394_v27, 1  ;;  %v1863_v46 = vrot.slane %v1718_v0, 1  ;;  %v1866_v48 = vrot.slane %v1721_v1, 1 }
  0x25   : > { %v430_v37 = vrot.slane %v1621_v31, 1  ;;  %v1856_v44 = vsel %vm281_vm0, %v384_v36, %v388_v26  ;;  %v437_v49 = vrot.slane %v1734_v8, 1  ;;  %v439_v54 = vrot.slane %v1739_v11, 1 }
  0x26   : > { %v397_v39 = vsel %vm281_vm0, %v1848_v33, %v396_v35  ;;  %v1873_v50 = vsel %vm429_vm1, %v1863_v46, %v1866_v48  ;;  %v434_v52 = vsel %vm429_vm1, %v431_v38, %v1863_v46  ;;  %v441_v55 = vrot.slane %v1744_v16, 1 }
  0x27   : > { %v432_v45 = vsel %vm429_vm1, %v430_v37, %v431_v38  ;;  %v1879_v53 = vsel %vm429_vm1, %v1866_v48, %v437_v49  ;;  %v443_v56 = vrot.slane %v1750_v25, 1  ;;  %v1893_v58 = vsel %vm429_vm1, %v437_v49, %v439_v54 }
  0x28   : > { %v1890_v57 = vsel %vm429_vm1, %v439_v54, %v441_v55  ;;  %v445_v61 = vrot.slane %v1759_v32, 1  ;;  %v447_v3 = vrot.slane %v1772_v40, 1  ;;  %v449_v6 = vrot.slane %v1778_v42, 1 }
  0x29   : > { %412 = vrot.lane.b32.xlu1 %v1807_v62, %s1672_s18  ;;  %410 = vrot.lane.b32.xlu0 %v1810_v63, %s1672_s18  ;;  %v1896_v60 = vsel %vm429_vm1, %v441_v55, %v443_v56  ;;  %v451_v13 = vrot.slane %v1791_v51, 1  ;;  %v453_v14 = vrot.slane %v1803_v59, 1  ;;  %v1925_v17 = vrot.slane %v1814_v4, 1 }
  0x2a   : > { %414 = vrot.lane.b32.xlu2 %v1817_v7, %s1672_s18  ;;  %v1908_v9 = vsel %vm429_vm1, %v445_v61, %v447_v3  ;;  %v1911_v10 = vsel %vm429_vm1, %v443_v56, %v445_v61  ;;  %v1914_v12 = vsel %vm429_vm1, %v447_v3, %v449_v6  ;;  %v457_v22 = vrot.slane %v1825_v15, 1  ;;  %v1622_v61 = vld [vmem:[%s1715_s17 + $0x8] sm:$0xf0]  ;;  %v1623_v3 = vld [vmem:[%s1715_s17 + $0x8] sm:$0xe] }
  0x2b   : > { %v1928_v18 = vsel %vm429_vm1, %v451_v13, %v453_v14  ;;  %v1931_v19 = vsel %vm429_vm1, %v449_v6, %v451_v13  ;;  %v1935_v21 = vsel %vm429_vm1, %v453_v14, %v1925_v17 }
  0x2c   : > { %v458_v23 = vsel %vm429_vm1, %v1925_v17, %v457_v22  ;;  %v1624_v22 = vor.u32 %v1623_v3, %v1622_v61  ;;  %v1625_v3 = vld [vmem:[%s1715_s17 + $0x10] sm:$0xf0] }
  0x31   : > { %418 = vrot.lane.b32.xlu1 %v1831_v20, %s1672_s18  ;;  %416 = vrot.lane.b32.xlu0 %v1837_v24, %s1672_s18 }
  0x32   : > { %420 = vrot.lane.b32.xlu2 %v1842_v30, %s1672_s18 }
  0x39   : > { %424 = vrot.lane.b32.xlu1 %v397_v39, %s1672_s18  ;;  %422 = vrot.lane.b32.xlu0 %v1856_v44, %s1672_s18 }
  0x3a   : > { %459 = vrot.lane.b32.xlu2 %v432_v45, %s1673_s19 }
  0x41   : > { %463 = vrot.lane.b32.xlu1 %v1873_v50, %s1673_s19  ;;  %461 = vrot.lane.b32.xlu0 %v434_v52, %s1673_s19 }
  0x42   : > { %465 = vrot.lane.b32.xlu2 %v1879_v53, %s1673_s19 }
  0x49   : > { %469 = vrot.lane.b32.xlu1 %v1890_v57, %s1673_s19  ;;  %467 = vrot.lane.b32.xlu0 %v1893_v58, %s1673_s19 }
  0x4a   : > { %471 = vrot.lane.b32.xlu2 %v1896_v60, %s1673_s19 }
  0x51   : > { %475 = vrot.lane.b32.xlu1 %v1908_v9, %s1673_s19  ;;  %473 = vrot.lane.b32.xlu0 %v1911_v10, %s1673_s19 }
  0x52   : > { %477 = vrot.lane.b32.xlu2 %v1914_v12, %s1673_s19 }
  0x59   : > { %481 = vrot.lane.b32.xlu1 %v1928_v18, %s1673_s19  ;;  %479 = vrot.lane.b32.xlu0 %v1931_v19, %s1673_s19 }
  0x5a   : > { %483 = vrot.lane.b32.xlu2 %v1935_v21, %s1673_s19 }
  0x61   : > { %492 = vrot.lane.b32.xlu1 %v1729_v5, %s1674_s20  ;;  %485 = vrot.lane.b32.xlu0 %v458_v23, %s1673_s19  ;;  %v567_v23 = vrot.slane %v1624_v22, 1 }
  0x62   : > { %494 = vrot.lane.b32.xlu2 %v1718_v0, %s1674_s20 }
  0x69   : > { %498 = vrot.lane.b32.xlu1 %v1734_v8, %s1674_s20  ;;  %496 = vrot.lane.b32.xlu0 %v1721_v1, %s1674_s20 }
  0x6a   : > { %500 = vrot.lane.b32.xlu2 %v1739_v11, %s1674_s20 }
  0x71   : > { %504 = vrot.lane.b32.xlu1 %v1750_v25, %s1674_s20  ;;  %502 = vrot.lane.b32.xlu0 %v1744_v16, %s1674_s20 }
  0x72   : > { %506 = vrot.lane.b32.xlu2 %v1759_v32, %s1674_s20 }
  0x74   : > { %v1955_v15 = vpop.permute.xlu2 %406 }
  0x79   : > { %510 = vrot.lane.b32.xlu1 %v1778_v42, %s1674_s20  ;;  %508 = vrot.lane.b32.xlu0 %v1772_v40, %s1674_s20 }
  0x7a   : > { %512 = vrot.lane.b32.xlu2 %v1791_v51, %s1674_s20 }
  0x7c   : > { %v409_v26 = vpop.permute.xlu2 %408 }
  0x7d   : > { %v1962_v27 = vsel %vm715_vm2, %v1739_v11, %v409_v26 }
  0x81   : > { %516 = vrot.lane.b32.xlu1 %v1814_v4, %s1674_s20  ;;  %514 = vrot.lane.b32.xlu0 %v1803_v59, %s1674_s20 }
  0x82   : > { %518 = vrot.lane.b32.xlu2 %v1965_v29, %s1674_s20 }
  0x84   : > { %v1970_v31 = vpop.permute.xlu2 %414 }
  0x89   : > { %538 = vrot.lane.b32.xlu1 %v1754_v28, %s1675_s21  ;;  %536 = vrot.lane.b32.xlu0 %v1781_v43, %s1675_s21 }
  0x8a   : > { %540 = vrot.lane.b32.xlu2 %v1775_v41, %s1675_s21 }
  0x8b   : > { %v403_v35 = vpop.permute.xlu1 %402  ;;  %v399_v36 = vpop.permute.xlu0 %398 }
  0x8c   : > { %v721_v37 = vsel %vm715_vm2, %v1718_v0, %v403_v35  ;;  %v421_v38 = vpop.permute.xlu2 %420  ;;  %v717_v49 = vsel %vm715_vm2, %v1724_v2, %v399_v36 }
  0x8d   : > { %v1982_v39 = vsel %vm715_vm2, %v1791_v51, %v421_v38 }
  0x91   : > { %544 = vrot.lane.b32.xlu1 %v1786_v47, %s1675_s21  ;;  %542 = vrot.lane.b32.xlu0 %v1765_v34, %s1675_s21 }
  0x92   : > { %546 = vrot.lane.b32.xlu2 %v1810_v63, %s1675_s21 }
  0x93   : > { %v405_v43 = vpop.permute.xlu1 %404  ;;  %v401_v45 = vpop.permute.xlu0 %400 }
  0x94   : > { %v460_v52 = vpop.permute.xlu2 %459  ;;  %v723_v6 = vsel %vm715_vm2, %v1721_v1, %v405_v43 }
  0x95   : > { %v1993_v54 = vsel %vm744_vm3, %v717_v49, %v460_v52  ;;  %v568_v52 = vsel %vm429_vm1, %v567_v23, %v1863_v46 }
  0x99   : > { %550 = vrot.lane.b32.xlu1 %v1817_v7, %s1675_s21  ;;  %548 = vrot.lane.b32.xlu0 %v1807_v62, %s1675_s21 }
  0x9a   : > { %552 = vrot.lane.b32.xlu2 %v1837_v24, %s1675_s21 }
  0x9b   : > { %v1999_v55 = vpop.permute.xlu1 %412  ;;  %v411_v56 = vpop.permute.xlu0 %410 }
  0x9c   : > { %v729_v2 = vsel %vm715_vm2, %v1744_v16, %v411_v56  ;;  %v466_v13 = vpop.permute.xlu2 %465 }
  0x9d   : > { %v2010_v14 = vsel %vm744_vm3, %v723_v6, %v466_v13  ;;  %v1626_v6 = vld [vmem:[%s1715_s17 + $0x10] sm:$0xe] }
  0x9e   : > { %v1627_v23 = vor.u32 %v1626_v6, %v1625_v3 }
  0xa1   : > { %556 = vrot.lane.b32.xlu1 %v1842_v30, %s1675_s21  ;;  %554 = vrot.lane.b32.xlu0 %v1831_v20, %s1675_s21 }
  0xa2   : > { %558 = vrot.lane.b32.xlu2 %v1856_v44, %s1675_s21 }
  0xa3   : > { %v419_v26 = vpop.permute.xlu1 %418  ;;  %v417_v35 = vpop.permute.xlu0 %416 }
  0xa4   : > { %v737_v36 = vsel %vm715_vm2, %v1778_v42, %v419_v26  ;;  %v735_v38 = vsel %vm715_vm2, %v1772_v40, %v417_v35  ;;  %v472_v43 = vpop.permute.xlu2 %471  ;;  %v719_v26 = vsel %vm715_vm2, %v1729_v5, %v401_v45  ;;  %v725_v5 = vsel %vm715_vm2, %v1734_v8, %v1955_v15 }
  0xa5   : > { %v2023_v49 = vsel %vm744_vm3, %v729_v2, %v472_v43  ;;  %v733_v15 = vsel %vm715_vm2, %v1759_v32, %v1970_v31 }
  0xa9   : > { %579 = vrot.lane.b32.xlu1 %v1893_v58, %s1676_s22  ;;  %573 = vrot.lane.b32.xlu0 %v568_v52, %s1676_s22 }
  0xaa   : > { %606 = vrot.lane.b32.xlu2 %v1718_v0, %s1677_s23  ;;  %v681_v0 = vrot.slane %v1627_v23, 1 }
  0xab   : > { %v425_v56 = vpop.permute.xlu1 %424  ;;  %v423_v61 = vpop.permute.xlu0 %422 }
  0xac   : > { %v743_v2 = vsel %vm715_vm2, %v1814_v4, %v425_v56  ;;  %v741_v46 = vsel %vm715_vm2, %v1803_v59, %v423_v61  ;;  %v478_v13 = vpop.permute.xlu2 %477 }
  0xad   : > { %v2039_v22 = vsel %vm744_vm3, %v735_v38, %v478_v13 }
  0xb1   : > { %650 = vrot.lane.b32.xlu1 %v1754_v28, %s1678_s24  ;;  %612 = vrot.lane.b32.xlu0 %v1739_v11, %s1677_s23  ;;  %v682_v11 = vsel %vm429_vm1, %v681_v0, %v1866_v48 }
  0xb2   : > { %656 = vrot.lane.b32.xlu2 %v1786_v47, %s1678_s24 }
  0xb3   : > { %v464_v35 = vpop.permute.xlu1 %463  ;;  %v462_v43 = vpop.permute.xlu0 %461 }
  0xb4   : > { %v750_v38 = vsel %vm744_vm3, %v721_v37, %v464_v35  ;;  %v748_v52 = vsel %vm744_vm3, %v719_v26, %v462_v43  ;;  %v484_v56 = vpop.permute.xlu2 %483 }
  0xb5   : > { %v2052_v61 = vsel %vm744_vm3, %v741_v46, %v484_v56 }
  0xb9   : > { %693 = vrot.lane.b32.xlu1 %v1890_v57, %s1679_s25  ;;  %687 = vrot.lane.b32.xlu0 %v682_v11, %s1679_s25 }
  0xba   : > { %587 = vrot.lane.b32.xlu2 %v1908_v9, %s1676_s22 }
  0xbb   : > { %v470_v28 = vpop.permute.xlu1 %469  ;;  %v468_v47 = vpop.permute.xlu0 %467 }
  0xbc   : > { %v756_v37 = vsel %vm744_vm3, %v1962_v27, %v470_v28  ;;  %v754_v48 = vsel %vm744_vm3, %v725_v5, %v468_v47  ;;  %v495_v45 = vpop.permute.xlu2 %494  ;;  %v731_v27 = vsel %vm715_vm2, %v1750_v25, %v1999_v55 }
  0xbd   : > { %v2068_v3 = vsel %vm773_vm4, %v748_v52, %v495_v45 }
  0xc1   : > { %664 = vrot.lane.b32.xlu1 %v1837_v24, %s1678_s24  ;;  %620 = vrot.lane.b32.xlu0 %v1772_v40, %s1677_s23 }
  0xc2   : > { %701 = vrot.lane.b32.xlu2 %v1914_v12, %s1679_s25 }
  0xc3   : > { %v476_v6 = vpop.permute.xlu1 %475  ;;  %v474_v46 = vpop.permute.xlu0 %473 }
  0xc4   : > { %v762_v13 = vsel %vm744_vm3, %v733_v15, %v476_v6  ;;  %v760_v24 = vsel %vm744_vm3, %v731_v27, %v474_v46  ;;  %v501_v23 = vpop.permute.xlu2 %500  ;;  %v955_v15 = vld [vmem:[%s2729_s1 + $0x20] sm:$0xf] }
  0xc5   : > { %v2085_v40 = vsel %vm773_vm4, %v754_v48, %v501_v23  ;;  %v973_v27 = vunpack.c.l.b16 %v955_v15  ;;  %v2188_v23 = vrot.slane %v1965_v29, 1 }
  0xc7   : > { %v978_v6 = vpack.c.b16 %v973_v27, %v973_v27 }
  0xc9   : > { %581 = vrot.lane.b32.xlu1 %v1890_v57, %s1676_s22  ;;  %575 = vrot.lane.b32.xlu0 %v1873_v50, %s1676_s22 }
  0xca   : > { %608 = vrot.lane.b32.xlu2 %v1721_v1, %s1677_s23 }
  0xcb   : > { %v482_v31 = vpop.permute.xlu1 %481  ;;  %v480_v55 = vpop.permute.xlu0 %479 }
  0xcc   : > { %v768_v0 = vsel %vm744_vm3, %v1982_v39, %v482_v31  ;;  %v766_v26 = vsel %vm744_vm3, %v737_v36, %v480_v55  ;;  %v507_v35 = vpop.permute.xlu2 %506  ;;  %v1604_v31 = vld [vmem:[%s2729_s1 + $0x18] sm:$0xff] }
  0xcd   : > { %v2097_v43 = vsel %vm773_vm4, %v760_v24, %v507_v35 }
  0xd1   : > { %652 = vrot.lane.b32.xlu1 %v1775_v41, %s1678_s24  ;;  %614 = vrot.lane.b32.xlu0 %v1744_v16, %s1677_s23 }
  0xd2   : > { %658 = vrot.lane.b32.xlu2 %v1810_v63, %s1678_s24 }
  0xd3   : > { %v493_v50 = vpop.permute.xlu1 %492  ;;  %v486_v1 = vpop.permute.xlu0 %485 }
  0xd4   : > { %v2107_v57 = vsel %vm773_vm4, %v1993_v54, %v493_v50  ;;  %v772_v39 = vsel %vm744_vm3, %v743_v2, %v486_v1  ;;  %v513_v36 = vpop.permute.xlu2 %512 }
  0xd5   : > { %v2111_v52 = vsel %vm773_vm4, %v766_v26, %v513_v36  ;;  %v1603_v26 = vld [vmem:[%s2729_s1 + $0x10] sm:$0xff] }
  0xd9   : > { %695 = vrot.lane.b32.xlu1 %v1896_v60, %s1679_s25  ;;  %689 = vrot.lane.b32.xlu0 %v1879_v53, %s1679_s25 }
  0xda   : > { %589 = vrot.lane.b32.xlu2 %v1914_v12, %s1676_s22 }
  0xdb   : > { %v499_v16 = vpop.permute.xlu1 %498  ;;  %v497_v41 = vpop.permute.xlu0 %496 }
  0xdc   : > { %v2121_v63 = vsel %vm773_vm4, %v2010_v14, %v499_v16  ;;  %v779_v54 = vsel %vm773_vm4, %v750_v38, %v497_v41  ;;  %v519_v2 = vpop.permute.xlu2 %518 }
  0xdd   : > { %v2125_v56 = vsel %vm773_vm4, %v772_v39, %v519_v2  ;;  %v528_v2 = vshrl.u32 %v1965_v29, 16 }
  0xe1   : > { %666 = vrot.lane.b32.xlu1 %v1831_v20, %s1678_s24  ;;  %622 = vrot.lane.b32.xlu0 %v1778_v42, %s1677_s23 }
  0xe2   : > { %703 = vrot.lane.b32.xlu2 %v1931_v19, %s1679_s25 }
  0xe3   : > { %v505_v11 = vpop.permute.xlu1 %504  ;;  %v503_v12 = vpop.permute.xlu0 %502 }
  0xe4   : > { %v2135_v14 = vsel %vm773_vm4, %v2023_v49, %v505_v11  ;;  %v785_v38 = vsel %vm773_vm4, %v756_v37, %v503_v12  ;;  %v541_v5 = vpop.permute.xlu2 %540 }
  0xe5   : > { %v2139_v28 = vsel %vm802_vm5, %v779_v54, %v541_v5  ;;  %v2248_v54 = vld [vmem:[%s1715_s17 + $0x78] sm:$0xff] }
  0xe6   : > { %v638_v11 = vshll.u32 %v2248_v54, 16  ;;  %v202_v5 = vld [vmem:[%s1715_s17 + $0x78] sm:$0x1] }
  0xe9   : > { %583 = vrot.lane.b32.xlu1 %v1896_v60, %s1676_s22  ;;  %577 = vrot.lane.b32.xlu0 %v1879_v53, %s1676_s22 }
  0xea   : > { %610 = vrot.lane.b32.xlu2 %v1734_v8, %s1677_s23 }
  0xeb   : > { %v511_v42 = vpop.permute.xlu1 %510  ;;  %v509_v20 = vpop.permute.xlu0 %508 }
  0xec   : > { %v2149_v49 = vsel %vm773_vm4, %v2039_v22, %v511_v42  ;;  %v791_v47 = vsel %vm773_vm4, %v762_v13, %v509_v20  ;;  %v547_v37 = vpop.permute.xlu2 %546  ;;  %v1680_v42 = vmov 0  }
  0xed   : > { %v2153_v48 = vsel %vm802_vm5, %v785_v38, %v547_v37  ;;  %1661 = vset.pattern.permute.xlu1 %v1680_v42  ;;  %1662 = vset.pattern.permute.xlu2 %v1680_v42 }
  0xee   : > { %1663 = vset.pattern.permute.xlu0 %v1680_v42  ;;  %v1098_v42 = vld [vmem:[%s2730_s2 + $0x18] sm:$0xff] }
  0xf1   : > { %654 = vrot.lane.b32.xlu1 %v1765_v34, %s1678_s24  ;;  %616 = vrot.lane.b32.xlu0 %v1750_v25, %s1677_s23  ;;  %v524_v25 = vshll.u32 %v1965_v29, 16 }
  0xf2   : > { %660 = vrot.lane.b32.xlu2 %v1807_v62, %s1678_s24 }
  0xf3   : > { %v517_v53 = vpop.permute.xlu1 %516  ;;  %v515_v8 = vpop.permute.xlu0 %514  ;;  %v2177_v62 = vrot.slane %v524_v25, 1 }
  0xf4   : > { %v2163_v60 = vsel %vm773_vm4, %v2052_v61, %v517_v53  ;;  %v797_v22 = vsel %vm773_vm4, %v768_v0, %v515_v8  ;;  %v553_v45 = vpop.permute.xlu2 %552  ;;  %v1014_v61 = vsel %vm1012_vm6, %v978_v6, 0  ;;  %v206_v53 = vld [vmem:[%s1715_s17 + $0x80] sm:$0x1]  ;;  %s1503_s17 = sshll.u32 %s2757_s13, 1 }
  0xf5   : > { %v2170_v34 = vsel %vm802_vm5, %v791_v47, %v553_v45  ;;  %1019 = vmatpush.bf16.msra.mxu0 %v1014_v61  ;;  %1628 = vmatpush.bf16.msra.mxu1 %v1014_v61  ;;  %v527_v0 = vsel %vm281_vm0, %v1848_v33, %v2177_v62  ;;  %v530_v12 = vor.u32 %v528_v2, %v2177_v62  ;;  %v635_v6 = vunpack.c.l.b16 %v206_v53  ;;  %s2629_s20 = scalar_lea.vmem %s2731_s3, %s1503_s17 }
  0xf6   : > { %1629 = vmatpush.bf16.msra.mxu2 %v1014_v61  ;;  %1630 = vmatpush.bf16.msra.mxu3 %v1014_v61 }
  0xf9   : > { %697 = vrot.lane.b32.xlu1 %v1911_v10, %s1679_s25  ;;  %691 = vrot.lane.b32.xlu0 %v1893_v58, %s1679_s25 }
  0xfa   : > { %595 = vrot.lane.b32.xlu2 %v1935_v21, %s1676_s22  ;;  %1020 = vmatpush.bf16.msra.mxu0 %v1604_v31 }
  0xfb   : > { %v539_v46 = vpop.permute.xlu1 %538  ;;  %v2181_v13 = vpop.permute.xlu0 %536  ;;  %1631 = vmatpush.bf16.msra.mxu1 %v1604_v31  ;;  %1632 = vmatpush.bf16.msra.mxu2 %v1604_v31 }
  0xfc   : > { %v2185_v24 = vsel %vm802_vm5, %v2068_v3, %v539_v46  ;;  %v559_v58 = vpop.permute.xlu2 %558  ;;  %v570_v3 = vsel %vm429_vm1, %v1925_v17, %v2188_v23  ;;  %1633 = vmatpush.bf16.msra.mxu3 %v1604_v31  ;;  %v804_v8 = vsel %vm802_vm5, %v2107_v57, %v2181_v13 }
  0xfd   : > { %v2194_v55 = vsel %vm802_vm5, %v797_v22, %v559_v58 }
  0xfe   : > { %1021 = vmatpush.bf16.msra.mxu0 %v1603_v26 }
  0xff   : > { %1634 = vmatpush.bf16.msra.mxu1 %v1603_v26  ;;  %1635 = vmatpush.bf16.msra.mxu2 %v1603_v26 }
 0x100   : > { %1636 = vmatpush.bf16.msra.mxu3 %v1603_v26 }
 0x101   : > { %672 = vrot.lane.b32.xlu1 %v527_v0, %s1678_s24  ;;  %628 = vrot.lane.b32.xlu0 %v1814_v4, %s1677_s23  ;;  %v1602_v4 = vld [vmem:[%s2729_s1 + $0x8] sm:$0xff] }
 0x102   : > { %709 = vrot.lane.b32.xlu2 %v570_v3, %s1679_s25  ;;  %1022 = vmatpush.bf16.msra.mxu0 %v1602_v4 }
 0x103   : > { %v545_v35 = vpop.permute.xlu1 %544  ;;  %v543_v33 = vpop.permute.xlu0 %542  ;;  %1637 = vmatpush.bf16.msra.mxu1 %v1602_v4  ;;  %1638 = vmatpush.bf16.msra.mxu2 %v1602_v4 }
 0x104   : > { %v2211_v17 = vsel %vm802_vm5, %v2085_v40, %v545_v35  ;;  %v2213_v50 = vpop.permute.xlu2 %606  ;;  %v1601_v40 = vld [vmem:[%s2729_s1] sm:$0xff]  ;;  %1639 = vmatpush.bf16.msra.mxu3 %v1602_v4  ;;  %v810_v22 = vsel %vm802_vm5, %v2121_v63, %v543_v33  ;;  %v642_v35 = vshrl.u32 %v2248_v54, 16 }
 0x106   : > { %1023 = vmatpush.bf16.msra.mxu0 %v1601_v40 }
 0x107   : > { %1640 = vmatpush.bf16.msra.mxu1 %v1601_v40  ;;  %1641 = vmatpush.bf16.msra.mxu2 %v1601_v40 }
 0x108   : > { %1642 = vmatpush.bf16.msra.mxu3 %v1601_v40 }
 0x109   : > { %624 = vrot.lane.b32.xlu1 %v1791_v51, %s1677_s23  ;;  %591 = vrot.lane.b32.xlu0 %v1931_v19, %s1676_s22 }
 0x10a   : > { %668 = vrot.lane.b32.xlu2 %v1842_v30, %s1678_s24 }
 0x10b   : > { %v2225_v1 = vpop.permute.xlu1 %550  ;;  %v549_v39 = vpop.permute.xlu0 %548 }
 0x10c   : > { %v2231_v36 = vsel %vm802_vm5, %v2135_v14, %v549_v39  ;;  %v657_v51 = vpop.permute.xlu2 %656  ;;  %v640_v14 = vrot.slane %v638_v11, 1 }
 0x10e   : > { %v641_v20 = vsel %vm281_vm0, %v530_v12, %v640_v14 }
 0x111   : > { %585 = vrot.lane.b32.xlu1 %v1911_v10, %s1676_s22  ;;  %705 = vrot.lane.b32.xlu0 %v1928_v18, %s1679_s25 }
 0x112   : > { %618 = vrot.lane.b32.xlu2 %v1759_v32, %s1677_s23 }
 0x113   : > { %v557_v19 = vpop.permute.xlu1 %556  ;;  %v555_v30 = vpop.permute.xlu0 %554 }
 0x114   : > { %v2241_v16 = vsel %vm802_vm5, %v2111_v52, %v557_v19  ;;  %v2245_v41 = vsel %vm802_vm5, %v2149_v49, %v555_v30  ;;  %v2250_v10 = vpop.permute.xlu2 %587  ;;  %v644_v19 = vor.u32 %v642_v35, %v640_v14 }
 0x119   : > { %699 = vrot.lane.b32.xlu1 %v1908_v9, %s1679_s25  ;;  %662 = vrot.lane.b32.xlu0 %v1817_v7, %s1678_s24  ;;  %v521_v9 = vunpack.c.l.b16 %v202_v5  ;;  %v683_v7 = vrot.slane %v2248_v54, 1 }
 0x11a   : > { %560 = vrot.lane.b32.xlu2 %v527_v0, %s1675_s21  ;;  %v636_v0 = vpack.c.b16 %v635_v6, %v635_v6 }
 0x11b   : > { %v580_v32 = vpop.permute.xlu1 %579  ;;  %v574_v52 = vpop.permute.xlu0 %573  ;;  %v522_v37 = vpack.c.b16 %v521_v9, %v521_v9 }
 0x11c   : > { %v702_v38 = vpop.permute.xlu2 %701  ;;  %v839_v15 = vsel %vm831_vm7, %v810_v22, %v580_v32  ;;  %v833_v25 = vsel %vm831_vm7, %v804_v8, %v574_v52  ;;  %v646_v33 = vshll.u32 %v636_v0, 16  ;;  %v1095_v52 = vld [vmem:[%s2730_s2] sm:$0xff] }
 0x11d   : > { %v532_v57 = vshll.u32 %v522_v37, 16  ;;  %v862_v63 = vsel %vm860_vm8, %v833_v25, %v2213_v50  ;;  %v571_v50 = vrot.slane %v522_v37, 1  ;;  %v1101_v25 = vld [vmem:[%s2730_s2 + $0x30] sm:$0xff] }
 0x11e   : > { %v648_v30 = vrot.slane %v646_v33, 1 }
 0x11f   : > { %v534_v31 = vrot.slane %v532_v57, 1  ;;  %v572_v2 = vsel %vm429_vm1, %v2188_v23, %v571_v50  ;;  %v1109_v50 = vld [vmem:[%s2730_s2 + $0x70] sm:$0xff] }
 0x121   : > { %630 = vrot.lane.b32.xlu1 %v1965_v29, %s1677_s23  ;;  %597 = vrot.lane.b32.xlu0 %v570_v3, %s1676_s22  ;;  %v684_v29 = vsel %vm429_vm1, %v2188_v23, %v683_v7  ;;  %v535_v26 = vsel %vm281_vm0, %v530_v12, %v534_v31  ;;  %v1096_v12 = vld [vmem:[%s2730_s2 + $0x8] sm:$0xff] }
 0x122   : > { %674 = vrot.lane.b32.xlu2 %v641_v20, %s1678_s24 }
 0x123   : > { %v651_v49 = vpop.permute.xlu1 %650  ;;  %v613_v47 = vpop.permute.xlu0 %612 }
 0x124   : > { %v2273_v45 = vpop.permute.xlu2 %608  ;;  %v868_v27 = vsel %vm860_vm8, %v839_v15, %v613_v47  ;;  %v891_v62 = vsel %vm889_vm9, %v862_v63, %v651_v49  ;;  %v1099_v49 = vld [vmem:[%s2730_s2 + $0x20] sm:$0xff]  ;;  %v1102_v15 = vld [vmem:[%s2730_s2 + $0x38] sm:$0xff] }
 0x125   : > { %v897_v13 = vsel %vm889_vm9, %v868_v27, %v657_v51 }
 0x129   : > { %593 = vrot.lane.b32.xlu1 %v1928_v18, %s1676_s22  ;;  %711 = vrot.lane.b32.xlu0 %v684_v29, %s1679_s25 }
 0x12a   : > { %626 = vrot.lane.b32.xlu2 %v1803_v59, %s1677_s23  ;;  %v818_v59 = vsel %vm802_vm5, %v2097_v43, %v2225_v1  ;;  %v649_v43 = vsel %vm281_vm0, %v644_v19, %v648_v30  ;;  %v1110_v19 = vld [vmem:[%s2730_s2 + $0x78] sm:$0xff] }
 0x12b   : > { %v694_v61 = vpop.permute.xlu1 %693  ;;  %v688_v46 = vpop.permute.xlu0 %687  ;;  %v847_v4 = vsel %vm831_vm7, %v818_v59, %v2250_v10  ;;  %v685_v10 = vrot.slane %v636_v0, 1  ;;  %v1106_v0 = vld [vmem:[%s2730_s2 + $0x58] sm:$0xff] }
 0x12c   : > { %v920_v58 = vsel %vm918_vm10, %v891_v62, %v688_v46  ;;  %v926_v18 = vsel %vm918_vm10, %v897_v13, %v694_v61  ;;  %v659_v3 = vpop.permute.xlu2 %658  ;;  %v1103_v46 = vld [vmem:[%s2730_s2 + $0x40] sm:$0xff]  ;;  %v1105_v13 = vld [vmem:[%s2730_s2 + $0x50] sm:$0xff] }
 0x12d   : > { %1572 = vmatmul.msk.bf16.vlgmr.msra.gmra.mxu0 %vm983_vm11, %v920_v58  ;;  %1575 = vmatmul.msk.bf16.vlgmr.msra.gmra.mxu1 %vm983_vm11, %v926_v18  ;;  %v686_v23 = vsel %vm429_vm1, %v683_v7, %v685_v10  ;;  %v1104_v58 = vld [vmem:[%s2730_s2 + $0x48] sm:$0xff] }
 0x12e   : > { %v1112_v10 = vld [vmem:[%s2730_s2 + $0x88] sm:$0xff] }
 0x131   : > { %707 = vrot.lane.b32.xlu1 %v1935_v21, %s1679_s25  ;;  %670 = vrot.lane.b32.xlu0 %v1856_v44, %s1678_s24 }
 0x132   : > { %562 = vrot.lane.b32.xlu2 %v535_v26, %s1675_s21  ;;  %v1107_v26 = vld [vmem:[%s2730_s2 + $0x60] sm:$0xff] }
 0x133   : > { %v665_v40 = vpop.permute.xlu1 %664  ;;  %v621_v39 = vpop.permute.xlu0 %620 }
 0x134   : > { %v876_v51 = vsel %vm860_vm8, %v847_v4, %v621_v39  ;;  %v590_v1 = vpop.permute.xlu2 %589  ;;  %v1111_v4 = vld [vmem:[%s2730_s2 + $0x80] sm:$0xff] }
 0x135   : > { %v905_v21 = vsel %vm889_vm9, %v876_v51, %v665_v40  ;;  %v849_v27 = vsel %vm831_vm7, %v2170_v34, %v590_v1 }
 0x136   : > { %v934_v44 = vsel %vm918_vm10, %v905_v21, %v702_v38 }
 0x137   : > { %1579 = vmatmul.msk.bf16.vlgmr.msra.gmra.mxu2 %vm983_vm11, %v934_v44 }
 0x139   : > { %632 = vrot.lane.b32.xlu1 %v2248_v54, %s1677_s23  ;;  %599 = vrot.lane.b32.xlu0 %v572_v2, %s1676_s22  ;;  %v1097_v54 = vld [vmem:[%s2730_s2 + $0x10] sm:$0xff] }
 0x13a   : > { %676 = vrot.lane.b32.xlu2 %v649_v43, %s1678_s24 }
 0x13b   : > { %v582_v11 = vpop.permute.xlu1 %581  ;;  %v576_v32 = vpop.permute.xlu0 %575 }
 0x13c   : > { %v704_v5 = vpop.permute.xlu2 %703  ;;  %v841_v20 = vsel %vm831_vm7, %v2211_v17, %v582_v11  ;;  %v835_v9 = vsel %vm831_vm7, %v2185_v24, %v576_v32  ;;  %v1114_v11 = vld [vmem:[%s2730_s2 + $0x98] sm:$0xff]  ;;  %v1113_v32 = vld [vmem:[%s2730_s2 + $0x90] sm:$0xff] }
 0x13d   : > { %v864_v47 = vsel %vm860_vm8, %v835_v9, %v2273_v45  ;;  %v1100_v45 = vld [vmem:[%s2730_s2 + $0x28] sm:$0xff] }
 0x141   : > { %1125 = vperm.xlu1 %1661, %v1095_v52   ;;  %713 = vrot.lane.b32.xlu0 %v686_v23, %s1679_s25 }
 0x142   : > { %1130 = vperm.xlu2 %1662, %v1096_v12  }
 0x143   : > { %v653_v14 = vpop.permute.xlu1 %652  ;;  %v615_v38 = vpop.permute.xlu0 %614 }
 0x144   : > { %v870_v7 = vsel %vm860_vm8, %v841_v20, %v615_v38  ;;  %v893_v37 = vsel %vm889_vm9, %v864_v47, %v653_v14  ;;  %v611_v29 = vpop.permute.xlu2 %610  ;;  %v1117_v20 = vld [vmem:[%s2730_s2 + $0xb0] sm:$0xff]  ;;  %v1118_v47 = vld [vmem:[%s2730_s2 + $0xb8] sm:$0xff] }
 0x145   : > { %v899_v17 = vsel %vm889_vm9, %v870_v7, %v659_v3  ;;  %v1108_v3 = vld [vmem:[%s2730_s2 + $0x68] sm:$0xff] }
 0x149   : > { %1140 = vperm.xlu1 %1661, %v1098_v42   ;;  %1135 = vperm.xlu0 %1663, %v1097_v54   ;;  %v1115_v54 = vld [vmem:[%s2730_s2 + $0xa0] sm:$0xff] }
 0x14a   : > { %1145 = vperm.xlu2 %1662, %v1099_v49  }
 0x14b   : > { %v696_v53 = vpop.permute.xlu1 %695  ;;  %v690_v8 = vpop.permute.xlu0 %689 }
 0x14c   : > { %v922_v24 = vsel %vm918_vm10, %v893_v37, %v690_v8  ;;  %v928_v22 = vsel %vm918_vm10, %v899_v17, %v696_v53  ;;  %v661_v34 = vpop.permute.xlu2 %660  ;;  %v1120_v37 = vld [vmem:[%s2730_s2 + $0xc8] sm:$0xff]  ;;  %v1119_v17 = vld [vmem:[%s2730_s2 + $0xc0] sm:$0xff] }
 0x14d   : > { %1573 = vmatmul.msk.bf16.gmra.mxu0 %vm983_vm11, %v922_v24  ;;  %1576 = vmatmul.msk.bf16.gmra.mxu1 %vm983_vm11, %v928_v22 }
 0x151   : > { %1150 = vperm.xlu1 %1661, %v1100_v45   ;;  %1160 = vperm.xlu0 %1663, %v1102_v15   ;;  %v1121_v45 = vld [vmem:[%s2730_s2 + $0xd0] sm:$0xff] }
 0x152   : > { %1155 = vperm.xlu2 %1662, %v1101_v25   ;;  %v1122_v25 = vld [vmem:[%s2730_s2 + $0xd8] sm:$0xff] }
 0x153   : > { %v667_v57 = vpop.permute.xlu1 %666  ;;  %v623_v6 = vpop.permute.xlu0 %622 }
 0x154   : > { %v878_v63 = vsel %vm860_vm8, %v849_v27, %v623_v6  ;;  %v596_v35 = vpop.permute.xlu2 %595 }
 0x155   : > { %v907_v62 = vsel %vm889_vm9, %v878_v63, %v667_v57  ;;  %v855_v52 = vsel %vm831_vm7, %v2194_v55, %v596_v35  ;;  %v1116_v55 = vld [vmem:[%s2730_s2 + $0xa8] sm:$0xff] }
 0x156   : > { %v936_v61 = vsel %vm918_vm10, %v907_v62, %v704_v5 }
 0x157   : > { %1580 = vmatmul.msk.bf16.gmra.mxu2 %vm983_vm11, %v936_v61 }
 0x159   : > { %1165 = vperm.xlu1 %1661, %v1103_v46   ;;  %1175 = vperm.xlu0 %1663, %v1105_v13  }
 0x15a   : > { %1170 = vperm.xlu2 %1662, %v1104_v58  }
 0x15b   : > { %v584_v18 = vpop.permute.xlu1 %583  ;;  %v578_v31 = vpop.permute.xlu0 %577 }
 0x15c   : > { %v843_v40 = vsel %vm831_vm7, %v2153_v48, %v584_v18  ;;  %v837_v39 = vsel %vm831_vm7, %v2139_v28, %v578_v31  ;;  %v710_v43 = vpop.permute.xlu2 %709 }
 0x15d   : > { %v866_v30 = vsel %vm860_vm8, %v837_v39, %v611_v29 }
 0x161   : > { %1180 = vperm.xlu1 %1661, %v1106_v0   ;;  %1190 = vperm.xlu0 %1663, %v1108_v3  }
 0x162   : > { %1185 = vperm.xlu2 %1662, %v1107_v26  }
 0x163   : > { %v655_v33 = vpop.permute.xlu1 %654  ;;  %v617_v59 = vpop.permute.xlu0 %616 }
 0x164   : > { %v872_v51 = vsel %vm860_vm8, %v843_v40, %v617_v59  ;;  %v895_v21 = vsel %vm889_vm9, %v866_v30, %v655_v33  ;;  %v669_v5 = vpop.permute.xlu2 %668 }
 0x165   : > { %v901_v48 = vsel %vm889_vm9, %v872_v51, %v661_v34 }
 0x169   : > { %1195 = vperm.xlu1 %1661, %v1109_v50   ;;  %1205 = vperm.xlu0 %1663, %v1111_v4  }
 0x16a   : > { %1200 = vperm.xlu2 %1662, %v1110_v19  }
 0x16b   : > { %v698_v44 = vpop.permute.xlu1 %697  ;;  %v692_v2 = vpop.permute.xlu0 %691 }
 0x16c   : > { %v924_v28 = vsel %vm918_vm10, %v895_v21, %v692_v2  ;;  %v930_v1 = vsel %vm918_vm10, %v901_v48, %v698_v44  ;;  %v619_v53 = vpop.permute.xlu2 %618 }
 0x16d   : > { %1574 = vmatmul.msk.bf16.gmra.mxu0 %vm983_vm11, %v924_v28  ;;  %1577 = vmatmul.msk.bf16.gmra.mxu1 %vm983_vm11, %v930_v1 }
 0x171   : > { %1210 = vperm.xlu1 %1661, %v1112_v10   ;;  %1220 = vperm.xlu0 %1663, %v1114_v11  }
 0x172   : > { %1215 = vperm.xlu2 %1662, %v1113_v32  }
 0x173   : > { %v673_v23 = vpop.permute.xlu1 %672  ;;  %v629_v12 = vpop.permute.xlu0 %628 }
 0x174   : > { %v884_v14 = vsel %vm860_vm8, %v855_v52, %v629_v12  ;;  %v561_v27 = vpop.permute.xlu2 %560 }
 0x175   : > { %v913_v38 = vsel %vm889_vm9, %v884_v14, %v673_v23 }
 0x176   : > { %v942_v42 = vsel %vm918_vm10, %v913_v38, %v710_v43 }
 0x177   : > { %1583 = vmatmul.msk.bf16.vlgmr.msra.gmra.mxu3 %vm983_vm11, %v942_v42 }
 0x179   : > { %1225 = vperm.xlu1 %1661, %v1115_v54   ;;  %1235 = vperm.xlu0 %1663, %v1117_v20  }
 0x17a   : > { %1230 = vperm.xlu2 %1662, %v1116_v55  }
 0x17b   : > { %v625_v9 = vpop.permute.xlu1 %624  ;;  %v592_v7 = vpop.permute.xlu0 %591 }
 0x17c   : > { %v851_v49 = vsel %vm831_vm7, %v2245_v41, %v592_v7  ;;  %v675_v34 = vpop.permute.xlu2 %674 }
 0x17d   : > { %v880_v8 = vsel %vm860_vm8, %v851_v49, %v625_v9 }
 0x17e   : > { %v909_v41 = vsel %vm889_vm9, %v880_v8, %v669_v5 }
 0x181   : > { %1240 = vperm.xlu1 %1661, %v1118_v47   ;;  %1250 = vperm.xlu0 %1663, %v1120_v37  }
 0x182   : > { %1245 = vperm.xlu2 %1662, %v1119_v17  }
 0x183   : > { %v586_v24 = vpop.permute.xlu1 %585  ;;  %v706_v22 = vpop.permute.xlu0 %705 }
 0x184   : > { %v938_v29 = vsel %vm918_vm10, %v909_v41, %v706_v22  ;;  %v845_v15 = vsel %vm831_vm7, %v2231_v36, %v586_v24  ;;  %v828_v36 = vsel %vm802_vm5, %v2163_v60, %v561_v27  ;;  %v627_v35 = vpop.permute.xlu2 %626 }
 0x185   : > { %1581 = vmatmul.msk.bf16.gmra.mxu2 %vm983_vm11, %v938_v29  ;;  %v874_v6 = vsel %vm860_vm8, %v845_v15, %v619_v53 }
 0x189   : > { %1255 = vperm.xlu1 %1661, %v1121_v45  }
 0x18a   : > { %1260 = vperm.xlu2 %1662, %v1122_v25  }
 0x18b   : > { %v700_v57 = vpop.permute.xlu1 %699  ;;  %v663_v63 = vpop.permute.xlu0 %662 }
 0x18c   : > { %v903_v62 = vsel %vm889_vm9, %v874_v6, %v663_v63  ;;  %v563_v39 = vpop.permute.xlu2 %562 }
 0x18d   : > { %v932_v61 = vsel %vm918_vm10, %v903_v62, %v700_v57  ;;  %v830_v19 = vsel %vm802_vm5, %v2125_v56, %v563_v39 }
 0x18e   : > { %1578 = vmatmul.msk.bf16.gmra.mxu1 %vm983_vm11, %v932_v61 }
 0x193   : > { %v631_v46 = vpop.permute.xlu1 %630  ;;  %v598_v13 = vpop.permute.xlu0 %597 }
 0x194   : > { %v857_v58 = vsel %vm831_vm7, %v828_v36, %v598_v13  ;;  %v677_v44 = vpop.permute.xlu2 %676 }
 0x195   : > { %v886_v18 = vsel %vm860_vm8, %v857_v58, %v631_v46 }
 0x196   : > { %v915_v3 = vsel %vm889_vm9, %v886_v18, %v675_v34 }
 0x19b   : > { %v594_v31 = vpop.permute.xlu1 %593  ;;  %v712_v0 = vpop.permute.xlu0 %711 }
 0x19c   : > { %v944_v26 = vsel %vm918_vm10, %v915_v3, %v712_v0  ;;  %v853_v33 = vsel %vm831_vm7, %v2241_v16, %v594_v31  ;;  %v2489_v23 = vpop.permute.xlu2 %1130 }
 0x19d   : > { %1584 = vmatmul.msk.bf16.gmra.mxu3 %vm983_vm11, %v944_v26  ;;  %v882_v60 = vsel %vm860_vm8, %v853_v33, %v627_v35 }
 0x1a3   : > { %v708_v59 = vpop.permute.xlu1 %707  ;;  %v671_v50 = vpop.permute.xlu0 %670 }
 0x1a4   : > { %v911_v4 = vsel %vm889_vm9, %v882_v60, %v671_v50  ;;  %v2497_v5 = vpop.permute.xlu2 %1145 }
 0x1a5   : > { %v940_v40 = vsel %vm918_vm10, %v911_v4, %v708_v59 }
 0x1a6   : > { %1582 = vmatmul.msk.bf16.gmra.mxu2 %vm983_vm11, %v940_v40 }
 0x1aa   : > { %v2475_v28 = vpop.f32.mrf.mxu0  ;;  %v2479_v10 = vpop.f32.mrf.mxu1 }
 0x1ab   : > { %v600_v51 = vpop.permute.xlu0 %599  ;;  %v633_v30 = vpop.permute.xlu1 %632 }
 0x1ac   : > { %v859_v21 = vsel %vm831_vm7, %v830_v19, %v600_v51  ;;  %v2523_v45 = vpop.permute.xlu2 %1155 }
 0x1ad   : > { %v888_v16 = vsel %vm860_vm8, %v859_v21, %v633_v30  ;;  %v1269_v27 = vmul.f32 %v2523_v45, %v2479_v10 }
 0x1ae   : > { %v917_v48 = vsel %vm889_vm9, %v888_v16, %v677_v44 }
 0x1b2   : > { %v2477_v1 = vpop.f32.mrf.mxu0  ;;  %v2483_v11 = vpop.f32.mrf.mxu1 }
 0x1b3   : > { %v714_v2 = vpop.permute.xlu0 %713  ;;  %v2485_v32 = vpop.permute.xlu1 %1125  ;;  %v1264_v42 = vmul.f32 %v2489_v23, %v2477_v1 }
 0x1b4   : > { %v946_v43 = vsel %vm918_vm10, %v917_v48, %v714_v2  ;;  %v1263_v54 = vmul.f32 %v2485_v32, %v2475_v28  ;;  %v2539_v36 = vpop.permute.xlu2 %1170 }
 0x1b5   : > { %1585 = vmatmul.msk.bf16.gmra.mxu3 %vm983_vm11, %v946_v43 }
 0x1b6   : > { %v1291_v49 = vadd.f32 %v1264_v42, %v1263_v54 }
 0x1ba   : > { %v2509_v7 = vpop.f32.mrf.mxu2 }
 0x1bb   : > { %v2495_v38 = vpop.permute.xlu1 %1140  ;;  %v2503_v20 = vpop.permute.xlu0 %1135 }
 0x1bc   : > { %v2555_v59 = vpop.permute.xlu2 %1185 }
 0x1c2   : > { %v2525_v25 = vpop.f32.mrf.mxu2 }
 0x1c3   : > { %v2517_v17 = vpop.permute.xlu1 %1150  ;;  %v2529_v57 = vpop.permute.xlu0 %1160 }
 0x1c4   : > { %v1270_v63 = vmul.f32 %v2529_v57, %v2483_v11  ;;  %v2573_v48 = vpop.permute.xlu2 %1200 }
 0x1c5   : > { %v1278_v54 = vmul.f32 %v2573_v48, %v2525_v25 }
 0x1ca   : > { %v2481_v56 = vpop.f32.mrf.mxu0  ;;  %v2491_v12 = vpop.f32.mrf.mxu1 }
 0x1cb   : > { %v1265_v9 = vmul.f32 %v2503_v20, %v2481_v56  ;;  %v2533_v62 = vpop.permute.xlu1 %1165  ;;  %v2543_v18 = vpop.permute.xlu0 %1175 }
 0x1cc   : > { %v1271_v34 = vmul.f32 %v2533_v62, %v2491_v12 }
 0x1cd   : > { %v1292_v53 = vadd.f32 %v1291_v49, %v1265_v9 }
 0x1d2   : > { %v2487_v52 = vpop.f32.mrf.mxu0  ;;  %v2505_v55 = vpop.f32.mrf.mxu1 }
 0x1d3   : > { %v1266_v47 = vmul.f32 %v2495_v38, %v2487_v52  ;;  %v1272_v31 = vmul.f32 %v2539_v36, %v2505_v55  ;;  %v2549_v3 = vpop.permute.xlu1 %1180  ;;  %v2561_v40 = vpop.permute.xlu0 %1190 }
 0x1d5   : > { %v1293_v24 = vadd.f32 %v1292_v53, %v1266_v47 }
 0x1da   : > { %v2537_v13 = vpop.f32.mrf.mxu2 }
 0x1db   : > { %v2569_v21 = vpop.permute.xlu1 %1195  ;;  %v2581_v49 = vpop.permute.xlu0 %1205 }
 0x1dc   : > { %v1277_v43 = vmul.f32 %v2569_v21, %v2509_v7 }
 0x1e2   : > { %v2553_v33 = vpop.f32.mrf.mxu2 }
 0x1e3   : > { %v2583_v47 = vpop.permute.xlu1 %1210 }
 0x1ea   : > { %v2493_v14 = vpop.f32.mrf.mxu0  ;;  %v2521_v41 = vpop.f32.mrf.mxu1 }
 0x1eb   : > { %v1267_v8 = vmul.f32 %v2497_v5, %v2493_v14  ;;  %v1273_v35 = vmul.f32 %v2543_v18, %v2521_v41 }
 0x1ed   : > { %v1294_v29 = vadd.f32 %v1293_v24, %v1267_v8  ;;  %v1279_v24 = vmul.f32 %v2581_v49, %v2537_v13 }
 0x1f2   : > { %v2513_v37 = vpop.f32.mrf.mxu0  ;;  %v2535_v61 = vpop.f32.mrf.mxu1 }
 0x1f3   : > { %v1268_v22 = vmul.f32 %v2517_v17, %v2513_v37  ;;  %v1274_v50 = vmul.f32 %v2549_v3, %v2535_v61 }
 0x1f5   : > { %v1295_v15 = vadd.f32 %v1294_v29, %v1268_v22  ;;  %v2589_v22 = vpop.permute.xlu2 %1215 }
 0x1f7   : > { %v1296_v6 = vadd.f32 %v1295_v15, %v1269_v27  ;;  %v1280_v15 = vmul.f32 %v2583_v47, %v2553_v33 }
 0x1f9   : > { %v1297_v46 = vadd.f32 %v1296_v6, %v1270_v63  ;;  %v2595_v6 = vpop.permute.xlu0 %1220 }
 0x1fa   : > { %v2565_v19 = vpop.f32.mrf.mxu3  ;;  %2741 = vst [vmem:[#allocation3_spill] sm:$0xff] %v2595_v6 }
 0x1fb   : > { %v1298_v58 = vadd.f32 %v1297_v46, %v1271_v34  ;;  %2740 = vst [vmem:[#allocation2_spill] sm:$0xff] %v2565_v19  ;;  %v2599_v34 = vpop.permute.xlu1 %1225 }
 0x1fc   : > { %2742 = vst [vmem:[#allocation4_spill] sm:$0xff] %v2599_v34 }
 0x1fd   : > { %v1299_v26 = vadd.f32 %v1298_v58, %v1272_v31  ;;  %v2603_v31 = vpop.permute.xlu2 %1230 }
 0x1fe   : > { %2743 = vst [vmem:[#allocation5_spill] sm:$0xff] %v2603_v31 }
 0x1ff   : > { %v1300_v60 = vadd.f32 %v1299_v26, %v1273_v35 }
 0x201   : > { %v1301_v51 = vadd.f32 %v1300_v60, %v1274_v50 }
 0x202   : > { %v2579_v9 = vpop.f32.mrf.mxu3 }
 0x208   : > { %v2571_v44 = vpop.f32.mrf.mxu2 }
 0x209   : > { %v1281_v58 = vmul.f32 %v2589_v22, %v2571_v44 }
 0x20b   : > { %v2547_v0 = vpop.f32.mrf.mxu1 }
 0x20c   : > { %v1275_v4 = vmul.f32 %v2555_v59, %v2547_v0 }
 0x20e   : > { %v1302_v16 = vadd.f32 %v1301_v51, %v1275_v4  ;;  %v2609_v51 = vpop.permute.xlu0 %1235 }
 0x20f   : > { %2744 = vst [vmem:[#allocation6_spill] sm:$0xff] %v2609_v51 }
 0x210   : > { %v2585_v8 = vpop.f32.mrf.mxu2 }
 0x211   : > { %v1282_v35 = vmul.f32 %v2595_v6, %v2585_v8 }
 0x213   : > { %v2563_v39 = vpop.f32.mrf.mxu1 }
 0x214   : > { %v1276_v30 = vmul.f32 %v2561_v40, %v2563_v39 }
 0x216   : > { %v1303_v2 = vadd.f32 %v1302_v16, %v1276_v30 }
 0x218   : > { %v1304_v42 = vadd.f32 %v1303_v2, %v1277_v43  ;;  %v2615_v43 = vpop.permute.xlu1 %1240 }
 0x219   : > { %2746 = vst [vmem:[#allocation8_spill] sm:$0xff] %v2615_v43 }
 0x21a   : > { %v1305_v53 = vadd.f32 %v1304_v42, %v1278_v54  ;;  %v1285_v42 = vmul.f32 %v2609_v51, %v2565_v19 }
 0x21c   : > { %v1306_v29 = vadd.f32 %v1305_v53, %v1279_v24  ;;  %v2619_v53 = vpop.permute.xlu2 %1245  ;;  %v1286_v24 = vmul.f32 %v2615_v43, %v2579_v9 }
 0x21d   : > { %2747 = vst [vmem:[#allocation9_spill] sm:$0xff] %v2619_v53 }
 0x21e   : > { %v1307_v63 = vadd.f32 %v1306_v29, %v1280_v15 }
 0x220   : > { %v2593_v27 = vpop.f32.mrf.mxu3  ;;  %v1308_v26 = vadd.f32 %v1307_v63, %v1281_v58 }
 0x221   : > { %v1287_v15 = vmul.f32 %v2619_v53, %v2593_v27 }
 0x222   : > { %v1309_v4 = vadd.f32 %v1308_v26, %v1282_v35  ;;  %v1251_v26 = vpop.permute.xlu0 %1250 }
 0x224   : > { %v1261_v51 = vpop.permute.xlu2 %1260 }
 0x228   : > { %v1087_v50 = vpop.f32.mrf.mxu3 }
 0x229   : > { %v2597_v46 = vpop.f32.mrf.mxu2 }
 0x22a   : > { %v1283_v60 = vmul.f32 %v2599_v34, %v2597_v46 }
 0x22c   : > { %v1310_v16 = vadd.f32 %v1309_v4, %v1283_v60  ;;  %v1288_v60 = vmul.f32 %v1251_v26, %v1087_v50 }
 0x231   : > { %v2611_v30 = vpop.f32.mrf.mxu2 }
 0x232   : > { %2745 = vst [vmem:[#allocation7_spill] sm:$0xff] %v2611_v30  ;;  %v1284_v2 = vmul.f32 %v2603_v31, %v2611_v30  ;;  %v1256_v31 = vpop.permute.xlu1 %1255 }
 0x234   : > { %v1311_v54 = vadd.f32 %v1310_v16, %v1284_v2 }
 0x236   : > { %v1312_v29 = vadd.f32 %v1311_v54, %v1285_v42 }
 0x238   : > { %v1313_v63 = vadd.f32 %v1312_v29, %v1286_v24  ;;  %v1090_v58 = vpop.f32.mrf.mxu3 }
 0x239   : > { %v1289_v34 = vmul.f32 %v1256_v31, %v1090_v58 }
 0x23a   : > { %v1314_v35 = vadd.f32 %v1313_v63, %v1287_v15 }
 0x23c   : > { %v1315_v4 = vadd.f32 %v1314_v35, %v1288_v60 }
 0x23e   : > { %v1316_v2 = vadd.f32 %v1315_v4, %v1289_v34 }
 0x240   : > { %v1092_v16 = vpop.f32.mrf.mxu3 }
 0x241   : > { %v1290_v19 = vmul.f32 %v1261_v51, %v1092_v16 }
 0x243   : > { %v1317_v6 = vadd.f32 %v1316_v2, %v1290_v19 }
 0x245   : > { %v1318_v30 = vrot.slane %v1317_v6, 4 }
 0x247   : > { %v1319_v43 = vadd.f32 %v1318_v30, %v1317_v6 }
 0x249   : > { %v1320_v42 = vrot.slane %v1319_v43, 2 }
 0x24b   : > { %v1321_v54 = vadd.f32 %v1320_v42, %v1319_v43 }
 0x24d   : > { %v1322_v53 = vrot.slane %v1321_v54, 1 }
 0x24f   : > { %v1323_v24 = vadd.f32 %v1322_v53, %v1321_v54 }
 0x251   : > { %1442 = vst [vmem:[%s2629_s20] sm:$0x1] %v1323_v24  ;;  %v2632_v29 = vmul.f32 0.0051020407, %v1323_v24 }
 0x253   : > { %v1325_v34 = vsub.f32 %v2475_v28, %v2632_v29  ;;  %v1326_v19 = vsub.f32 %v2477_v1, %v2632_v29  ;;  %v1350_v6 = vsub.f32 %v1087_v50, %v2632_v29  ;;  %v1351_v30 = vsub.f32 %v1090_v58, %v2632_v29 }
 0x254   : > { %v1352_v43 = vsub.f32 %v1092_v16, %v2632_v29  ;;  %v1327_v15 = vsub.f32 %v2481_v56, %v2632_v29  ;;  %v1328_v1 = vsub.f32 %v2487_v52, %v2632_v29  ;;  %v1329_v50 = vsub.f32 %v2493_v14, %v2632_v29 }
 0x255   : > { %v1353_v53 = vmul.f32 %v1325_v34, %v2485_v32  ;;  %v1354_v63 = vmul.f32 %v1326_v19, %v2489_v23  ;;  %v2645_v35 = vmul.f32 %v1350_v6, %v1251_v26  ;;  %v2647_v60 = vmul.f32 %v1351_v30, %v1256_v31 }
 0x256   : > { %v2649_v28 = vmul.f32 %v1352_v43, %v1261_v51  ;;  %v1355_v58 = vmul.f32 %v1327_v15, %v2503_v20  ;;  %v1330_v32 = vsub.f32 %v2513_v37, %v2632_v29  ;;  %v1356_v23 = vmul.f32 %v1328_v1, %v2495_v38 }
 0x257   : > { %v1381_v4 = vmul.f32 %v1353_v53, %v1353_v53  ;;  %v1382_v56 = vmul.f32 %v1354_v63, %v1354_v63  ;;  %v1331_v31 = vsub.f32 %v2479_v10, %v2632_v29  ;;  %v1357_v51 = vmul.f32 %v1329_v50, %v2497_v5 }
 0x258   : > { %v1383_v26 = vmul.f32 %v1355_v58, %v1355_v58  ;;  %v1332_v52 = vsub.f32 %v2483_v11, %v2632_v29  ;;  %v1358_v14 = vmul.f32 %v1330_v32, %v2517_v17  ;;  %v1384_v20 = vmul.f32 %v1356_v23, %v1356_v23 }
 0x259   : > { %v1409_v16 = vadd.f32 %v1382_v56, %v1381_v4  ;;  %v1333_v42 = vsub.f32 %v2491_v12, %v2632_v29  ;;  %v1359_v37 = vmul.f32 %v1331_v31, %v2523_v45  ;;  %v1385_v38 = vmul.f32 %v1357_v51, %v1357_v51 }
 0x25a   : > { %v1334_v10 = vsub.f32 %v2505_v55, %v2632_v29  ;;  %v1360_v5 = vmul.f32 %v1332_v52, %v2529_v57  ;;  %v1386_v24 = vmul.f32 %v1358_v14, %v1358_v14  ;;  %v1335_v11 = vsub.f32 %v2521_v41, %v2632_v29 }
 0x25b   : > { %v1410_v2 = vadd.f32 %v1409_v16, %v1383_v26  ;;  %v1361_v17 = vmul.f32 %v1333_v42, %v2533_v62  ;;  %v1387_v19 = vmul.f32 %v1359_v37, %v1359_v37  ;;  %v1336_v12 = vsub.f32 %v2535_v61, %v2632_v29 }
 0x25c   : > { %v1362_v45 = vmul.f32 %v1334_v10, %v2539_v36  ;;  %v1388_v30 = vmul.f32 %v1360_v5, %v1360_v5  ;;  %v1337_v55 = vsub.f32 %v2547_v0, %v2632_v29  ;;  %v1363_v57 = vmul.f32 %v1335_v11, %v2543_v18 }
 0x25d   : > { %v1411_v54 = vadd.f32 %v1410_v2, %v1384_v20  ;;  %v1389_v15 = vmul.f32 %v1361_v17, %v1361_v17  ;;  %v1338_v41 = vsub.f32 %v2563_v39, %v2632_v29  ;;  %v1364_v62 = vmul.f32 %v1336_v12, %v2549_v3  ;;  %v2753_v12 = vld [vmem:[#allocation6_spill] sm:$0xff] }
 0x25e   : > { %v1390_v63 = vmul.f32 %v1362_v45, %v1362_v45  ;;  %v1339_v61 = vsub.f32 %v2509_v7, %v2632_v29  ;;  %v1365_v36 = vmul.f32 %v1337_v55, %v2555_v59  ;;  %v1391_v50 = vmul.f32 %v1363_v57, %v1363_v57  ;;  %v2754_v55 = vld [vmem:[#allocation8_spill] sm:$0xff] }
 0x25f   : > { %v1412_v34 = vadd.f32 %v1411_v54, %v1385_v38  ;;  %v1340_v0 = vsub.f32 %v2525_v25, %v2632_v29  ;;  %v1366_v18 = vmul.f32 %v1338_v41, %v2561_v40  ;;  %v1392_v4 = vmul.f32 %v1364_v62, %v1364_v62  ;;  %v2755_v41 = vld [vmem:[#allocation9_spill] sm:$0xff] }
 0x260   : > { %v1341_v39 = vsub.f32 %v2537_v13, %v2632_v29  ;;  %v1367_v3 = vmul.f32 %v1339_v61, %v2569_v21  ;;  %v1393_v32 = vmul.f32 %v1365_v36, %v1365_v36  ;;  %v1342_v7 = vsub.f32 %v2553_v33, %v2632_v29 }
 0x261   : > { %v1413_v6 = vadd.f32 %v1412_v34, %v1386_v24  ;;  %v1368_v59 = vmul.f32 %v1340_v0, %v2573_v48  ;;  %v1394_v31 = vmul.f32 %v1366_v18, %v1366_v18  ;;  %v1343_v25 = vsub.f32 %v2571_v44, %v2632_v29  ;;  %v2748_v44 = vld [vmem:[#allocation7_spill] sm:$0xff] }
 0x262   : > { %v1369_v40 = vmul.f32 %v1341_v39, %v2581_v49  ;;  %v1395_v26 = vmul.f32 %v1367_v3, %v1367_v3  ;;  %v1344_v13 = vsub.f32 %v2585_v8, %v2632_v29  ;;  %v1370_v21 = vmul.f32 %v1342_v7, %v2583_v47  ;;  %v2749_v49 = vld [vmem:[#allocation3_spill] sm:$0xff]  ;;  %v2750_v8 = vld [vmem:[#allocation2_spill] sm:$0xff]  ;;  %v2751_v47 = vld [vmem:[#allocation4_spill] sm:$0xff] }
 0x263   : > { %v1414_v43 = vadd.f32 %v1413_v6, %v1387_v19  ;;  %v1396_v52 = vmul.f32 %v1368_v59, %v1368_v59  ;;  %v1345_v33 = vsub.f32 %v2597_v46, %v2632_v29  ;;  %v1371_v48 = vmul.f32 %v1343_v25, %v2589_v22  ;;  %v2752_v22 = vld [vmem:[#allocation5_spill] sm:$0xff] }
 0x264   : > { %v1397_v20 = vmul.f32 %v1369_v40, %v1369_v40  ;;  %v1346_v42 = vsub.f32 %v2748_v44, %v2632_v29  ;;  %v1372_v37 = vmul.f32 %v1344_v13, %v2749_v49  ;;  %v1398_v38 = vmul.f32 %v1370_v21, %v1370_v21 }
 0x265   : > { %v1415_v53 = vadd.f32 %v1414_v43, %v1388_v30  ;;  %v1347_v10 = vsub.f32 %v2750_v8, %v2632_v29  ;;  %v1373_v5 = vmul.f32 %v1345_v33, %v2751_v47  ;;  %v1399_v24 = vmul.f32 %v1371_v48, %v1371_v48 }
 0x266   : > { %v1348_v46 = vsub.f32 %v2579_v9, %v2632_v29  ;;  %v1374_v11 = vmul.f32 %v1346_v42, %v2752_v22  ;;  %v1400_v17 = vmul.f32 %v1372_v37, %v1372_v37  ;;  %v1349_v6 = vsub.f32 %v2593_v27, %v2632_v29 }
 0x267   : > { %v1416_v1 = vadd.f32 %v1415_v53, %v1389_v15  ;;  %v1375_v45 = vmul.f32 %v1347_v10, %v2753_v12  ;;  %v1401_v30 = vmul.f32 %v1373_v5, %v1373_v5  ;;  %v1406_v27 = vmul.f32 %v2645_v35, %v2645_v35 }
 0x268   : > { %v1376_v57 = vmul.f32 %v1348_v46, %v2754_v55  ;;  %v1402_v15 = vmul.f32 %v1374_v11, %v1374_v11  ;;  %v1377_v62 = vmul.f32 %v1349_v6, %v2755_v41  ;;  %v1408_v18 = vmul.f32 %v2649_v28, %v2649_v28 }
 0x269   : > { %v1417_v58 = vadd.f32 %v1416_v1, %v1390_v63  ;;  %v1403_v63 = vmul.f32 %v1375_v45, %v1375_v45 }
 0x26a   : > { %v1404_v9 = vmul.f32 %v1376_v57, %v1376_v57  ;;  %v1405_v36 = vmul.f32 %v1377_v62, %v1377_v62 }
 0x26b   : > { %v1418_v56 = vadd.f32 %v1417_v58, %v1391_v50  ;;  %v1407_v58 = vmul.f32 %v2647_v60, %v2647_v60 }
 0x26d   : > { %v1419_v23 = vadd.f32 %v1418_v56, %v1392_v4 }
 0x26f   : > { %v1420_v51 = vadd.f32 %v1419_v23, %v1393_v32 }
 0x271   : > { %v1421_v16 = vadd.f32 %v1420_v51, %v1394_v31 }
 0x273   : > { %v1422_v14 = vadd.f32 %v1421_v16, %v1395_v26 }
 0x275   : > { %v1423_v2 = vadd.f32 %v1422_v14, %v1396_v52 }
 0x277   : > { %v1424_v54 = vadd.f32 %v1423_v2, %v1397_v20 }
 0x279   : > { %v1425_v34 = vadd.f32 %v1424_v54, %v1398_v38 }
 0x27b   : > { %v1426_v19 = vadd.f32 %v1425_v34, %v1399_v24 }
 0x27d   : > { %v1427_v43 = vadd.f32 %v1426_v19, %v1400_v17 }
 0x27f   : > { %v1428_v53 = vadd.f32 %v1427_v43, %v1401_v30 }
 0x281   : > { %v1429_v1 = vadd.f32 %v1428_v53, %v1402_v15 }
 0x283   : > { %v1430_v61 = vadd.f32 %v1429_v1, %v1403_v63 }
 0x285   : > { %v1431_v50 = vadd.f32 %v1430_v61, %v1404_v9 }
 0x287   : > { %v1432_v29 = vadd.f32 %v1431_v50, %v1405_v36 }
 0x289   : > { %v1433_v0 = vadd.f32 %v1432_v29, %v1406_v27 }
 0x28b   : > { %v1434_v4 = vadd.f32 %v1433_v0, %v1407_v58 }
 0x28d   : > { %v1435_v56 = vadd.f32 %v1434_v4, %v1408_v18 }
 0x28f   : > { %v1436_v39 = vrot.slane %v1435_v56, 4 }
 0x291   : > { %v1437_v3 = vadd.f32 %v1436_v39, %v1435_v56 }
 0x293   : > { %v1438_v32 = vrot.slane %v1437_v3, 2 }
 0x295   : > { %v1439_v23 = vadd.f32 %v1438_v32, %v1437_v3 }
 0x297   : > { %v1440_v7 = vrot.slane %v1439_v23, 1 }
 0x299   : > { %v1441_v59 = vadd.f32 %v1440_v7, %v1439_v23 }
 0x29b   : > { %1443 = vst [vmem:[%s2629_s20 + $0x1] sm:$0x1] %v1441_v59 }
 0x29c PF: > { %s13_s12 = sadd.s32 1, %s1670_s12  }
 0x29d   : > { %p10_p4 = scmp.ge.s32.totalorder %s13_s12, 4  }
 0x29f   :  { %12 = sbr.rel (!%p10_p4) target bundleno = 1 (0x1), region = 62 }

</bundles_post_ra>
